<compile_context>
chip_gen: v7x
topology: tpu7x:2x2x1
jax: 0.10.0
libtpu: 0.0.40
codegen_flags: <defaults>
</compile_context>

<pallas_src>
import functools

import jax
import jax.numpy as jnp
from jax.experimental import pallas as pl
from jax.experimental.pallas import tpu as pltpu


KSIZES = (3, 4, 5)   # conv1 / conv2 / conv3 kernel sizes
C_REAL = 200         # real conv out-channels
C_PAD = 256          # padded to 256 for lane-dense MXU output / stores
OUT_REAL = 2         # logits
OUT_PAD = 128        # padded logits width for a lane-dense final store


# ---------------------------------------------------------------------------
# Fused kernel: conv1d(k=3,4,5, valid) -> time max-pool -> +bias -> ReLU
#               -> concat -> fc1+ReLU -> fc2+ReLU -> fc3 (padded logits)
# One grid step handles `bt` batch rows.
# ---------------------------------------------------------------------------
def _fused_cnn_mlp_kernel(x_ref, w3_ref, w4_ref, w5_ref, cb_ref,
                          fc1_ref, b1_ref, fc2_ref, b2_ref, fc3_ref, b3_ref,
                          o_ref, feats_ref, *, bt):
    # x_ref: (bt, L, E)            wK_ref: (K*E, C_PAD)  (im2col weight layout)
    # cb_ref: (1, 3*C_PAD)         fc1: (3*C_PAD, 256)   fc2: (256, 128)
    # fc3: (128, OUT_PAD)          o_ref: (bt, OUT_PAD)  feats_ref: (bt, 3*C_PAD)
    L = x_ref.shape[1]
    conv_w_refs = (w3_ref, w4_ref, w5_ref)

    for r in range(bt):                       # static, small unrolled loop
        xr = x_ref[r]                         # (L, E)
        row = []
        for k, w_ref in zip(KSIZES, conv_w_refs):
            l_out = L - k + 1
            # im2col: stack the K shifted slices along lanes -> one deep matmul.
            cols = jnp.concatenate(
                [xr[j:j + l_out, :] for j in range(k)], axis=-1)   # (l_out, K*E)
            y = jnp.dot(cols, w_ref[...],
                        preferred_element_type=jnp.float32)        # (l_out, C_PAD)
            row.append(jnp.max(y, axis=0, keepdims=True))          # time max-pool
        feats_ref[pl.ds(r, 1), :] = jnp.concatenate(row, axis=-1)  # (1, 3*C_PAD)

    # Bias + ReLU after max-pool (equivalent: ReLU monotone, bias per-channel).
    f = jnp.maximum(feats_ref[...] + cb_ref[...], 0.0)             # (bt, 3*C_PAD)

    # MLP head (nn.Dropout(0.5) is identity at inference).
    h = jnp.dot(f, fc1_ref[...], preferred_element_type=jnp.float32) + b1_ref[...]
    h = jnp.maximum(h, 0.0)
    h = jnp.dot(h, fc2_ref[...], preferred_element_type=jnp.float32) + b2_ref[...]
    h = jnp.maximum(h, 0.0)
    o_ref[...] = (jnp.dot(h, fc3_ref[...], preferred_element_type=jnp.float32)
                  + b3_ref[...])


def cnn_classifier_forward(token_ids, params, *, bt=8):
    """token_ids: (B, L) int32 -> logits (B, 2) f32."""
    # TODO(synk): at production sizes fold this gather into the kernel via
    # PrefetchScalarGridSpec (token ids in SMEM + per-row DMA) to skip the HBM
    # round-trip of x_emb; kept as plain-JAX glue here.
    x_emb = jnp.take(params["embed"], token_ids, axis=0)           # (B, L, E) f32
    B, L, E = x_emb.shape

    bt = min(bt, B)
    n_tiles = -(-B // bt)
    b_pad = n_tiles * bt
    if b_pad != B:
        x_emb = jnp.pad(x_emb, ((0, b_pad - B), (0, 0), (0, 0)))

    w3, w4, w5 = params["conv_w"]
    cb = params["conv_b"]
    w1, b1, w2, b2, w3f, b3 = params["fc"]

    kern = functools.partial(_fused_cnn_mlp_kernel, bt=bt)
    full2d = lambda a: pl.BlockSpec(a.shape, lambda i: (0, 0))

    out = pl.pallas_call(
        kern,
        out_shape=jax.ShapeDtypeStruct((b_pad, OUT_PAD), jnp.float32),
        grid=(n_tiles,),
        in_specs=[
            pl.BlockSpec((bt, L, E), lambda i: (i, 0, 0)),
            full2d(w3), full2d(w4), full2d(w5), full2d(cb),
            full2d(w1), full2d(b1), full2d(w2), full2d(b2),
            full2d(w3f), full2d(b3),
        ],
        out_specs=pl.BlockSpec((bt, OUT_PAD), lambda i: (i, 0)),
        scratch_shapes=[pltpu.VMEM((bt, 3 * C_PAD), jnp.float32)],
        compiler_params=pltpu.CompilerParams(
            dimension_semantics=("parallel",)),
    )(x_emb, w3, w4, w5, cb, w1, b1, w2, b2, w3f, b3)

    return out[:B, :OUT_REAL]


# ---------------------------------------------------------------------------
# Parameters: deterministic synthetic "PyTorch-layout" params + kernel layout.
# ---------------------------------------------------------------------------
def make_torch_params(key, vocab, embed_dim, conv_channels=C_REAL):
    keys = jax.random.split(key, 16)
    # TODO(synk): RobertaModel.from_pretrained embedding checkpoint replaced by
    # a deterministic random table of the same role (vocab, EMBED_DIM).
    embed = jax.random.normal(keys[0], (vocab, embed_dim), jnp.float32) * 0.02

    convs = []
    for idx, k in enumerate(KSIZES):
        # PyTorch Conv1d weight layout: (C_out, C_in, K)
        w = jax.random.normal(keys[1 + idx], (conv_channels, embed_dim, k),
                              jnp.float32) * 0.05
        b = jax.random.normal(keys[4 + idx], (conv_channels,), jnp.float32) * 0.05
        convs.append((w, b))

    d_in = conv_channels * 3
    w1 = jax.random.normal(keys[7], (d_in, 256), jnp.float32) * 0.05
    b1 = jax.random.normal(keys[8], (256,), jnp.float32) * 0.05
    w2 = jax.random.normal(keys[9], (256, 128), jnp.float32) * 0.05
    b2 = jax.random.normal(keys[10], (128,), jnp.float32) * 0.05
    w3 = jax.random.normal(keys[11], (128, OUT_REAL), jnp.float32) * 0.05
    b3 = jax.random.normal(keys[12], (OUT_REAL,), jnp.float32) * 0.05
    return {"embed": embed, "convs": convs,
            "fc": (w1, b1, w2, b2, w3, b3)}


def prepare_params(raw):
    """Pure layout transform: im2col conv weights, channel/output zero-padding."""
    embed = raw["embed"]
    E = embed.shape[1]

    conv_w, conv_b = [], []
    for (w, b), k in zip(raw["convs"], KSIZES):
        c = w.shape[0]
        # (C, E, K) -> (K, E, C) -> (K*E, C), zero-pad channels to C_PAD.
        w_im2col = jnp.transpose(w, (2, 1, 0)).reshape(k * E, c)
        conv_w.append(jnp.pad(w_im2col, ((0, 0), (0, C_PAD - c))))
        conv_b.append(jnp.pad(b, (0, C_PAD - c)))
    cb = jnp.concatenate(conv_b).reshape(1, 3 * C_PAD)

    w1, b1, w2, b2, w3, b3 = raw["fc"]
    c = raw["convs"][0][1].shape[0]
    # fc1 rows rearranged/zero-padded to match the [3 x C_PAD] feature layout.
    w1_pad = jnp.zeros((3 * C_PAD, w1.shape[1]), jnp.float32)
    for g in range(3):
        w1_pad = w1_pad.at[g * C_PAD: g * C_PAD + c, :].set(
            w1[g * c:(g + 1) * c, :])
    w3_pad = jnp.pad(w3, ((0, 0), (0, OUT_PAD - OUT_REAL)))
    b3_pad = jnp.pad(b3, (0, OUT_PAD - OUT_REAL))

    return {
        "embed": embed,
        "conv_w": tuple(conv_w),
        "conv_b": cb,
        "fc": (w1_pad, b1.reshape(1, -1), w2, b2.reshape(1, -1),
               w3_pad, b3_pad.reshape(1, OUT_PAD)),
    }


# ---------------------------------------------------------------------------
# Pure-JAX reference (mirrors the torch forward) for a correctness check.
# ---------------------------------------------------------------------------
def reference_forward(token_ids, raw):
    x = jnp.take(raw["embed"], token_ids, axis=0)                  # (B, L, E)
    L = x.shape[1]
    feats = []
    for (w, b), k in zip(raw["convs"], KSIZES):
        l_out = L - k + 1
        y = sum(jnp.einsum("ble,ce->blc", x[:, j:j + l_out, :], w[:, :, j])
                for j in range(k)) + b                             # (B, l_out, C)
        y = jnp.maximum(y, 0.0)
        feats.append(jnp.max(y, axis=1))                           # (B, C)
    f = jnp.concatenate(feats, axis=1)                             # (B, 600)
    w1, b1, w2, b2, w3, b3 = raw["fc"]
    h = jnp.maximum(f @ w1 + b1, 0.0)
    h = jnp.maximum(h @ w2 + b2, 0.0)
    return h @ w3 + b3


if __name__ == "__main__":
    VOCAB, EMBED_DIM, SEQ_LEN, BATCH = 64, 32, 16, 2

    key = jax.random.PRNGKey(0)
    pkey, xkey = jax.random.split(key)
    raw = make_torch_params(pkey, VOCAB, EMBED_DIM)
    params = prepare_params(raw)
    token_ids = jax.random.randint(xkey, (BATCH, SEQ_LEN), 0, VOCAB, jnp.int32)

    logits = cnn_classifier_forward(token_ids, params)
    logits = jax.block_until_ready(logits)
    assert logits.shape == (BATCH, OUT_REAL) and logits.dtype == jnp.float32

    ref = jax.block_until_ready(reference_forward(token_ids, raw))
    assert bool(jnp.allclose(logits, ref, rtol=1e-3, atol=1e-4)), "mismatch vs reference"

    print("KERNEL_OK")
</pallas_src>

<mosaic_0001>
module attributes {stable_mosaic.version = 11 : i64} {
  func.func @_fused_cnn_mlp_kernel(%arg0: i32, %arg1: memref<2x16x32xf32, #tpu.memory_space<vmem>>, %arg2: memref<96x256xf32, #tpu.memory_space<vmem>>, %arg3: memref<128x256xf32, #tpu.memory_space<vmem>>, %arg4: memref<160x256xf32, #tpu.memory_space<vmem>>, %arg5: memref<1x768xf32, #tpu.memory_space<vmem>>, %arg6: memref<768x256xf32, #tpu.memory_space<vmem>>, %arg7: memref<1x256xf32, #tpu.memory_space<vmem>>, %arg8: memref<256x128xf32, #tpu.memory_space<vmem>>, %arg9: memref<1x128xf32, #tpu.memory_space<vmem>>, %arg10: memref<128x128xf32, #tpu.memory_space<vmem>>, %arg11: memref<1x128xf32, #tpu.memory_space<vmem>>, %arg12: memref<2x128xf32, #tpu.memory_space<vmem>>, %arg13: memref<2x768xf32, #tpu.memory_space<vmem>>) attributes {dimension_semantics = [#tpu.dimension_semantics<parallel>], iteration_bounds = array<i64: 1>, scalar_prefetch = 0 : i64, scratch_operands = 1 : i64, tpu.core_type = #tpu.core_type<tc>, window_params = [{transform_indices = @transform_0, window_bounds = array<i64: 2, 16, 32>}, {pipeline_mode = #tpu.pipeline_mode<synchronous>, transform_indices = @transform_1, window_bounds = array<i64: 96, 256>}, {pipeline_mode = #tpu.pipeline_mode<synchronous>, transform_indices = @transform_2, window_bounds = array<i64: 128, 256>}, {pipeline_mode = #tpu.pipeline_mode<synchronous>, transform_indices = @transform_3, window_bounds = array<i64: 160, 256>}, {pipeline_mode = #tpu.pipeline_mode<synchronous>, transform_indices = @transform_4, window_bounds = array<i64: 1, 768>}, {pipeline_mode = #tpu.pipeline_mode<synchronous>, transform_indices = @transform_5, window_bounds = array<i64: 768, 256>}, {pipeline_mode = #tpu.pipeline_mode<synchronous>, transform_indices = @transform_6, window_bounds = array<i64: 1, 256>}, {pipeline_mode = #tpu.pipeline_mode<synchronous>, transform_indices = @transform_7, window_bounds = array<i64: 256, 128>}, {pipeline_mode = #tpu.pipeline_mode<synchronous>, transform_indices = @transform_8, window_bounds = array<i64: 1, 128>}, {pipeline_mode = #tpu.pipeline_mode<synchronous>, transform_indices = @transform_9, window_bounds = array<i64: 128, 128>}, {pipeline_mode = #tpu.pipeline_mode<synchronous>, transform_indices = @transform_10, window_bounds = array<i64: 1, 128>}, {transform_indices = @transform_11, window_bounds = array<i64: 2, 128>}]} {
    %c0 = arith.constant 0 : index
    %c0_0 = arith.constant 0 : index
    %c0_1 = arith.constant 0 : index
    %0 = vector.load %arg1[%c0, %c0_0, %c0_1] : memref<2x16x32xf32, #tpu.memory_space<vmem>>, vector<1x16x32xf32>
    %1 = vector.shape_cast %0 : vector<1x16x32xf32> to vector<16x32xf32>
    %2 = vector.extract_strided_slice %1 {offsets = [0, 0], sizes = [14, 32], strides = [1, 1]} : vector<16x32xf32> to vector<14x32xf32>
    %3 = vector.extract_strided_slice %1 {offsets = [1, 0], sizes = [14, 32], strides = [1, 1]} : vector<16x32xf32> to vector<14x32xf32>
    %4 = vector.extract_strided_slice %1 {offsets = [2, 0], sizes = [14, 32], strides = [1, 1]} : vector<16x32xf32> to vector<14x32xf32>
    %5 = tpu.concatenate %2, %3, %4 in 1 : vector<14x32xf32>, vector<14x32xf32>, vector<14x32xf32> -> vector<14x96xf32>
    %c0_2 = arith.constant 0 : index
    %c0_3 = arith.constant 0 : index
    %6 = vector.load %arg2[%c0_2, %c0_3] : memref<96x256xf32, #tpu.memory_space<vmem>>, vector<96x256xf32>
    %cst = arith.constant dense<0.000000e+00> : vector<14x256xf32>
    %7 = tpu.matmul %5, %6, %cst {dimension_numbers = #tpu.dot_dimension_numbers<[1], [0], [0], [1], [0, 0, 1, 1], [], []>} : vector<14x96xf32>, vector<96x256xf32>, vector<14x256xf32> -> vector<14x256xf32>
    %cst_4 = arith.constant dense<0xFF800000> : vector<256xf32>
    %8 = vector.multi_reduction <maximumf>, %7, %cst_4 [0] : vector<14x256xf32> to vector<256xf32>
    %9 = vector.shape_cast %8 : vector<256xf32> to vector<1x256xf32>
    %10 = vector.extract_strided_slice %1 {offsets = [0, 0], sizes = [13, 32], strides = [1, 1]} : vector<16x32xf32> to vector<13x32xf32>
    %11 = vector.extract_strided_slice %1 {offsets = [1, 0], sizes = [13, 32], strides = [1, 1]} : vector<16x32xf32> to vector<13x32xf32>
    %12 = vector.extract_strided_slice %1 {offsets = [2, 0], sizes = [13, 32], strides = [1, 1]} : vector<16x32xf32> to vector<13x32xf32>
    %13 = vector.extract_strided_slice %1 {offsets = [3, 0], sizes = [13, 32], strides = [1, 1]} : vector<16x32xf32> to vector<13x32xf32>
    %14 = tpu.concatenate %10, %11, %12, %13 in 1 : vector<13x32xf32>, vector<13x32xf32>, vector<13x32xf32>, vector<13x32xf32> -> vector<13x128xf32>
    %c0_5 = arith.constant 0 : index
    %c0_6 = arith.constant 0 : index
    %15 = vector.load %arg3[%c0_5, %c0_6] : memref<128x256xf32, #tpu.memory_space<vmem>>, vector<128x256xf32>
    %cst_7 = arith.constant dense<0.000000e+00> : vector<13x256xf32>
    %16 = tpu.matmul %14, %15, %cst_7 {dimension_numbers = #tpu.dot_dimension_numbers<[1], [0], [0], [1], [0, 0, 1, 1], [], []>} : vector<13x128xf32>, vector<128x256xf32>, vector<13x256xf32> -> vector<13x256xf32>
    %cst_8 = arith.constant dense<0xFF800000> : vector<256xf32>
    %17 = vector.multi_reduction <maximumf>, %16, %cst_8 [0] : vector<13x256xf32> to vector<256xf32>
    %18 = vector.shape_cast %17 : vector<256xf32> to vector<1x256xf32>
    %19 = vector.extract_strided_slice %1 {offsets = [0, 0], sizes = [12, 32], strides = [1, 1]} : vector<16x32xf32> to vector<12x32xf32>
    %20 = vector.extract_strided_slice %1 {offsets = [1, 0], sizes = [12, 32], strides = [1, 1]} : vector<16x32xf32> to vector<12x32xf32>
    %21 = vector.extract_strided_slice %1 {offsets = [2, 0], sizes = [12, 32], strides = [1, 1]} : vector<16x32xf32> to vector<12x32xf32>
    %22 = vector.extract_strided_slice %1 {offsets = [3, 0], sizes = [12, 32], strides = [1, 1]} : vector<16x32xf32> to vector<12x32xf32>
    %23 = vector.extract_strided_slice %1 {offsets = [4, 0], sizes = [12, 32], strides = [1, 1]} : vector<16x32xf32> to vector<12x32xf32>
    %24 = tpu.concatenate %19, %20, %21, %22, %23 in 1 : vector<12x32xf32>, vector<12x32xf32>, vector<12x32xf32>, vector<12x32xf32>, vector<12x32xf32> -> vector<12x160xf32>
    %c0_9 = arith.constant 0 : index
    %c0_10 = arith.constant 0 : index
    %25 = vector.load %arg4[%c0_9, %c0_10] : memref<160x256xf32, #tpu.memory_space<vmem>>, vector<160x256xf32>
    %cst_11 = arith.constant dense<0.000000e+00> : vector<12x256xf32>
    %26 = tpu.matmul %24, %25, %cst_11 {dimension_numbers = #tpu.dot_dimension_numbers<[1], [0], [0], [1], [0, 0, 1, 1], [], []>} : vector<12x160xf32>, vector<160x256xf32>, vector<12x256xf32> -> vector<12x256xf32>
    %cst_12 = arith.constant dense<0xFF800000> : vector<256xf32>
    %27 = vector.multi_reduction <maximumf>, %26, %cst_12 [0] : vector<12x256xf32> to vector<256xf32>
    %28 = vector.shape_cast %27 : vector<256xf32> to vector<1x256xf32>
    %29 = tpu.concatenate %9, %18, %28 in 1 : vector<1x256xf32>, vector<1x256xf32>, vector<1x256xf32> -> vector<1x768xf32>
    %c0_13 = arith.constant 0 : index
    %c0_14 = arith.constant 0 : index
    %30 = vector.load %arg13[%c0_13, %c0_14] : memref<2x768xf32, #tpu.memory_space<vmem>>, vector<1x768xf32>
    tpu.vector_store %arg13[%c0_13, %c0_14], %29 {strides = array<i32>} : memref<2x768xf32, #tpu.memory_space<vmem>>, vector<1x768xf32>,
    %c1 = arith.constant 1 : index
    %c0_15 = arith.constant 0 : index
    %c0_16 = arith.constant 0 : index
    %31 = vector.load %arg1[%c1, %c0_15, %c0_16] : memref<2x16x32xf32, #tpu.memory_space<vmem>>, vector<1x16x32xf32>
    %32 = vector.shape_cast %31 : vector<1x16x32xf32> to vector<16x32xf32>
    %33 = vector.extract_strided_slice %32 {offsets = [0, 0], sizes = [14, 32], strides = [1, 1]} : vector<16x32xf32> to vector<14x32xf32>
    %34 = vector.extract_strided_slice %32 {offsets = [1, 0], sizes = [14, 32], strides = [1, 1]} : vector<16x32xf32> to vector<14x32xf32>
    %35 = vector.extract_strided_slice %32 {offsets = [2, 0], sizes = [14, 32], strides = [1, 1]} : vector<16x32xf32> to vector<14x32xf32>
    %36 = tpu.concatenate %33, %34, %35 in 1 : vector<14x32xf32>, vector<14x32xf32>, vector<14x32xf32> -> vector<14x96xf32>
    %c0_17 = arith.constant 0 : index
    %c0_18 = arith.constant 0 : index
    %37 = vector.load %arg2[%c0_17, %c0_18] : memref<96x256xf32, #tpu.memory_space<vmem>>, vector<96x256xf32>
    %cst_19 = arith.constant dense<0.000000e+00> : vector<14x256xf32>
    %38 = tpu.matmul %36, %37, %cst_19 {dimension_numbers = #tpu.dot_dimension_numbers<[1], [0], [0], [1], [0, 0, 1, 1], [], []>} : vector<14x96xf32>, vector<96x256xf32>, vector<14x256xf32> -> vector<14x256xf32>
    %cst_20 = arith.constant dense<0xFF800000> : vector<256xf32>
    %39 = vector.multi_reduction <maximumf>, %38, %cst_20 [0] : vector<14x256xf32> to vector<256xf32>
    %40 = vector.shape_cast %39 : vector<256xf32> to vector<1x256xf32>
    %41 = vector.extract_strided_slice %32 {offsets = [0, 0], sizes = [13, 32], strides = [1, 1]} : vector<16x32xf32> to vector<13x32xf32>
    %42 = vector.extract_strided_slice %32 {offsets = [1, 0], sizes = [13, 32], strides = [1, 1]} : vector<16x32xf32> to vector<13x32xf32>
    %43 = vector.extract_strided_slice %32 {offsets = [2, 0], sizes = [13, 32], strides = [1, 1]} : vector<16x32xf32> to vector<13x32xf32>
    %44 = vector.extract_strided_slice %32 {offsets = [3, 0], sizes = [13, 32], strides = [1, 1]} : vector<16x32xf32> to vector<13x32xf32>
    %45 = tpu.concatenate %41, %42, %43, %44 in 1 : vector<13x32xf32>, vector<13x32xf32>, vector<13x32xf32>, vector<13x32xf32> -> vector<13x128xf32>
    %c0_21 = arith.constant 0 : index
    %c0_22 = arith.constant 0 : index
    %46 = vector.load %arg3[%c0_21, %c0_22] : memref<128x256xf32, #tpu.memory_space<vmem>>, vector<128x256xf32>
    %cst_23 = arith.constant dense<0.000000e+00> : vector<13x256xf32>
    %47 = tpu.matmul %45, %46, %cst_23 {dimension_numbers = #tpu.dot_dimension_numbers<[1], [0], [0], [1], [0, 0, 1, 1], [], []>} : vector<13x128xf32>, vector<128x256xf32>, vector<13x256xf32> -> vector<13x256xf32>
    %cst_24 = arith.constant dense<0xFF800000> : vector<256xf32>
    %48 = vector.multi_reduction <maximumf>, %47, %cst_24 [0] : vector<13x256xf32> to vector<256xf32>
    %49 = vector.shape_cast %48 : vector<256xf32> to vector<1x256xf32>
    %50 = vector.extract_strided_slice %32 {offsets = [0, 0], sizes = [12, 32], strides = [1, 1]} : vector<16x32xf32> to vector<12x32xf32>
    %51 = vector.extract_strided_slice %32 {offsets = [1, 0], sizes = [12, 32], strides = [1, 1]} : vector<16x32xf32> to vector<12x32xf32>
    %52 = vector.extract_strided_slice %32 {offsets = [2, 0], sizes = [12, 32], strides = [1, 1]} : vector<16x32xf32> to vector<12x32xf32>
    %53 = vector.extract_strided_slice %32 {offsets = [3, 0], sizes = [12, 32], strides = [1, 1]} : vector<16x32xf32> to vector<12x32xf32>
    %54 = vector.extract_strided_slice %32 {offsets = [4, 0], sizes = [12, 32], strides = [1, 1]} : vector<16x32xf32> to vector<12x32xf32>
    %55 = tpu.concatenate %50, %51, %52, %53, %54 in 1 : vector<12x32xf32>, vector<12x32xf32>, vector<12x32xf32>, vector<12x32xf32>, vector<12x32xf32> -> vector<12x160xf32>
    %c0_25 = arith.constant 0 : index
    %c0_26 = arith.constant 0 : index
    %56 = vector.load %arg4[%c0_25, %c0_26] : memref<160x256xf32, #tpu.memory_space<vmem>>, vector<160x256xf32>
    %cst_27 = arith.constant dense<0.000000e+00> : vector<12x256xf32>
    %57 = tpu.matmul %55, %56, %cst_27 {dimension_numbers = #tpu.dot_dimension_numbers<[1], [0], [0], [1], [0, 0, 1, 1], [], []>} : vector<12x160xf32>, vector<160x256xf32>, vector<12x256xf32> -> vector<12x256xf32>
    %cst_28 = arith.constant dense<0xFF800000> : vector<256xf32>
    %58 = vector.multi_reduction <maximumf>, %57, %cst_28 [0] : vector<12x256xf32> to vector<256xf32>
    %59 = vector.shape_cast %58 : vector<256xf32> to vector<1x256xf32>
    %60 = tpu.concatenate %40, %49, %59 in 1 : vector<1x256xf32>, vector<1x256xf32>, vector<1x256xf32> -> vector<1x768xf32>
    %c1_29 = arith.constant 1 : index
    %c0_30 = arith.constant 0 : index
    %61 = vector.load %arg13[%c1_29, %c0_30] : memref<2x768xf32, #tpu.memory_space<vmem>>, vector<1x768xf32>
    tpu.vector_store %arg13[%c1_29, %c0_30], %60 {strides = array<i32>} : memref<2x768xf32, #tpu.memory_space<vmem>>, vector<1x768xf32>,
    %c0_31 = arith.constant 0 : index
    %c0_32 = arith.constant 0 : index
    %62 = vector.load %arg13[%c0_31, %c0_32] : memref<2x768xf32, #tpu.memory_space<vmem>>, vector<2x768xf32>
    %c0_33 = arith.constant 0 : index
    %c0_34 = arith.constant 0 : index
    %63 = vector.load %arg5[%c0_33, %c0_34] : memref<1x768xf32, #tpu.memory_space<vmem>>, vector<1x768xf32>
    %64 = vector.broadcast %63 : vector<1x768xf32> to vector<2x768xf32>
    %65 = arith.addf %62, %64 : vector<2x768xf32>
    %cst_35 = arith.constant 0.000000e+00 : f32
    %66 = vector.broadcast %cst_35 : f32 to vector<2x768xf32>
    %67 = arith.maximumf %65, %66 : vector<2x768xf32>
    %c0_36 = arith.constant 0 : index
    %c0_37 = arith.constant 0 : index
    %68 = vector.load %arg6[%c0_36, %c0_37] : memref<768x256xf32, #tpu.memory_space<vmem>>, vector<768x256xf32>
    %cst_38 = arith.constant dense<0.000000e+00> : vector<2x256xf32>
    %69 = tpu.matmul %67, %68, %cst_38 {dimension_numbers = #tpu.dot_dimension_numbers<[1], [0], [0], [1], [0, 0, 1, 1], [], []>} : vector<2x768xf32>, vector<768x256xf32>, vector<2x256xf32> -> vector<2x256xf32>
    %c0_39 = arith.constant 0 : index
    %c0_40 = arith.constant 0 : index
    %70 = vector.load %arg7[%c0_39, %c0_40] : memref<1x256xf32, #tpu.memory_space<vmem>>, vector<1x256xf32>
    %71 = vector.broadcast %70 : vector<1x256xf32> to vector<2x256xf32>
    %72 = arith.addf %69, %71 : vector<2x256xf32>
    %cst_41 = arith.constant 0.000000e+00 : f32
    %73 = vector.broadcast %cst_41 : f32 to vector<2x256xf32>
    %74 = arith.maximumf %72, %73 : vector<2x256xf32>
    %c0_42 = arith.constant 0 : index
    %c0_43 = arith.constant 0 : index
    %75 = vector.load %arg8[%c0_42, %c0_43] : memref<256x128xf32, #tpu.memory_space<vmem>>, vector<256x128xf32>
    %cst_44 = arith.constant dense<0.000000e+00> : vector<2x128xf32>
    %76 = tpu.matmul %74, %75, %cst_44 {dimension_numbers = #tpu.dot_dimension_numbers<[1], [0], [0], [1], [0, 0, 1, 1], [], []>} : vector<2x256xf32>, vector<256x128xf32>, vector<2x128xf32> -> vector<2x128xf32>
    %c0_45 = arith.constant 0 : index
    %c0_46 = arith.constant 0 : index
    %77 = vector.load %arg9[%c0_45, %c0_46] : memref<1x128xf32, #tpu.memory_space<vmem>>, vector<1x128xf32>
    %78 = vector.broadcast %77 : vector<1x128xf32> to vector<2x128xf32>
    %79 = arith.addf %76, %78 : vector<2x128xf32>
    %cst_47 = arith.constant 0.000000e+00 : f32
    %80 = vector.broadcast %cst_47 : f32 to vector<2x128xf32>
    %81 = arith.maximumf %79, %80 : vector<2x128xf32>
    %c0_48 = arith.constant 0 : index
    %c0_49 = arith.constant 0 : index
    %82 = vector.load %arg10[%c0_48, %c0_49] : memref<128x128xf32, #tpu.memory_space<vmem>>, vector<128x128xf32>
    %cst_50 = arith.constant dense<0.000000e+00> : vector<2x128xf32>
    %83 = tpu.matmul %81, %82, %cst_50 {dimension_numbers = #tpu.dot_dimension_numbers<[1], [0], [0], [1], [0, 0, 1, 1], [], []>} : vector<2x128xf32>, vector<128x128xf32>, vector<2x128xf32> -> vector<2x128xf32>
    %c0_51 = arith.constant 0 : index
    %c0_52 = arith.constant 0 : index
    %84 = vector.load %arg11[%c0_51, %c0_52] : memref<1x128xf32, #tpu.memory_space<vmem>>, vector<1x128xf32>
    %85 = vector.broadcast %84 : vector<1x128xf32> to vector<2x128xf32>
    %86 = arith.addf %83, %85 : vector<2x128xf32>
    %c0_53 = arith.constant 0 : index
    %c0_54 = arith.constant 0 : index
    %87 = vector.load %arg12[%c0_53, %c0_54] : memref<2x128xf32, #tpu.memory_space<vmem>>, vector<2x128xf32>
    tpu.vector_store %arg12[%c0_53, %c0_54], %86 {strides = array<i32>} : memref<2x128xf32, #tpu.memory_space<vmem>>, vector<2x128xf32>,
    return
  }
  func.func @transform_0(%arg0: i32) -> (i32, i32, i32) {
    %c0_i32 = arith.constant 0 : i32
    %c0_i32_0 = arith.constant 0 : i32
    %c0_i32_1 = arith.constant 0 : i32
    return %arg0, %c0_i32, %c0_i32_0 : i32, i32, i32
  }
  func.func @transform_1(%arg0: i32) -> (i32, i32) {
    %c0_i32 = arith.constant 0 : i32
    %c0_i32_0 = arith.constant 0 : i32
    %c0_i32_1 = arith.constant 0 : i32
    return %c0_i32, %c0_i32_0 : i32, i32
  }
  func.func @transform_2(%arg0: i32) -> (i32, i32) {
    %c0_i32 = arith.constant 0 : i32
    %c0_i32_0 = arith.constant 0 : i32
    %c0_i32_1 = arith.constant 0 : i32
    return %c0_i32, %c0_i32_0 : i32, i32
  }
  func.func @transform_3(%arg0: i32) -> (i32, i32) {
    %c0_i32 = arith.constant 0 : i32
    %c0_i32_0 = arith.constant 0 : i32
    %c0_i32_1 = arith.constant 0 : i32
    return %c0_i32, %c0_i32_0 : i32, i32
  }
  func.func @transform_4(%arg0: i32) -> (i32, i32) {
    %c0_i32 = arith.constant 0 : i32
    %c0_i32_0 = arith.constant 0 : i32
    %c0_i32_1 = arith.constant 0 : i32
    return %c0_i32, %c0_i32_0 : i32, i32
  }
  func.func @transform_5(%arg0: i32) -> (i32, i32) {
    %c0_i32 = arith.constant 0 : i32
    %c0_i32_0 = arith.constant 0 : i32
    %c0_i32_1 = arith.constant 0 : i32
    return %c0_i32, %c0_i32_0 : i32, i32
  }
  func.func @transform_6(%arg0: i32) -> (i32, i32) {
    %c0_i32 = arith.constant 0 : i32
    %c0_i32_0 = arith.constant 0 : i32
    %c0_i32_1 = arith.constant 0 : i32
    return %c0_i32, %c0_i32_0 : i32, i32
  }
  func.func @transform_7(%arg0: i32) -> (i32, i32) {
    %c0_i32 = arith.constant 0 : i32
    %c0_i32_0 = arith.constant 0 : i32
    %c0_i32_1 = arith.constant 0 : i32
    return %c0_i32, %c0_i32_0 : i32, i32
  }
  func.func @transform_8(%arg0: i32) -> (i32, i32) {
    %c0_i32 = arith.constant 0 : i32
    %c0_i32_0 = arith.constant 0 : i32
    %c0_i32_1 = arith.constant 0 : i32
    return %c0_i32, %c0_i32_0 : i32, i32
  }
  func.func @transform_9(%arg0: i32) -> (i32, i32) {
    %c0_i32 = arith.constant 0 : i32
    %c0_i32_0 = arith.constant 0 : i32
    %c0_i32_1 = arith.constant 0 : i32
    return %c0_i32, %c0_i32_0 : i32, i32
  }
  func.func @transform_10(%arg0: i32) -> (i32, i32) {
    %c0_i32 = arith.constant 0 : i32
    %c0_i32_0 = arith.constant 0 : i32
    %c0_i32_1 = arith.constant 0 : i32
    return %c0_i32, %c0_i32_0 : i32, i32
  }
  func.func @transform_11(%arg0: i32) -> (i32, i32) {
    %c0_i32 = arith.constant 0 : i32
    %c0_i32_0 = arith.constant 0 : i32
    return %arg0, %c0_i32 : i32, i32
  }
}

</mosaic_0001>

<bundles_post_ra>
// kernel: tpu_custom_call.1
= control target key start
LH: loop header
LB: loop body
LE: loop exit
PB: predicated region body
PF: predicated region fallthrough
CT: control target
= control target key end

     0   :  { %16 = vsyncpa [#allocation4], 0  ;;  %s3124_s0 = inlined_call_operand.hbm [shape: f32[2,16,32], index: 0, kind: input, shape index: {}]   ;;  %s3125_s1 = inlined_call_operand.hbm [shape: f32[96,256], index: 1, kind: input, shape index: {}]   ;;  %s3126_s2 = inlined_call_operand.hbm [shape: f32[128,256], index: 2, kind: input, shape index: {}]   ;;  %s3127_s3 = inlined_call_operand.hbm [shape: f32[160,256], index: 3, kind: input, shape index: {}]   ;;  %s3128_s4 = inlined_call_operand.vmem [shape: f32[1,768], index: 4, kind: input, shape index: {}]   ;;  %s3129_s5 = inlined_call_operand.hbm [shape: f32[768,256], index: 5, kind: input, shape index: {}]   ;;  %s3130_s6 = inlined_call_operand.vmem [shape: f32[1,256], index: 6, kind: input, shape index: {}]   ;;  %s3131_s7 = inlined_call_operand.hbm [shape: f32[256,128], index: 7, kind: input, shape index: {}]   ;;  %s3132_s8 = inlined_call_operand.vmem [shape: f32[1,128], index: 8, kind: input, shape index: {}]   ;;  %s3133_s9 = inlined_call_operand.hbm [shape: f32[128,128], index: 9, kind: input, shape index: {}]   ;;  %s3134_s10 = inlined_call_operand.vmem [shape: f32[1,128], index: 10, kind: input, shape index: {}]   ;;  %s3135_s11 = inlined_call_operand.hbm [shape: f32[2,128], index: 11, kind: output, shape index: {}]  }
   0x1   :  { %17 = vsyncpa [#allocation7], 0 }
   0x2   :  { %18 = vsyncpa [#allocation10], 0 }
   0x3   :  { %19 = vsyncpa [#allocation13], 0 }
   0x4   :  { %20 = vsyncpa [#allocation5], 0  ;;  %s2575_s17 = smov [#allocation6]   ;;  %s2389_s21 = scalar_lea.hbm %s3125_s1, 3072 }
   0x5   :  { %s38_s18 = sshll.u32 %s2575_s17, 4  ;;  %p2390_p0 = scmp.ne.s32.totalorder %s3125_s1, %s2389_s21  ;;  %s39_s18 = int_to_ptr.vmem [resolvable:$true] %s38_s18 }
   0x6   :  { %p2393_p1 = scmp.lt.u32.totalorder %s2389_s21, %s3125_s1 }
   0x8   :  { %p2395_p2 = pnand %p2393_p1, %p2390_p0 }
   0xa   :  { %2398 = shalt.err (!%p2395_p2)
}
   0xb   :  { %s2399_s26 = scalar_lea.vmem %s39_s18, 3072  ;;  %p2404_p4 = scmp.lt.s32.totalorder %s39_s18, %s39_s18 }
   0xc   :  { %p2400_p3 = scmp.ne.s32.totalorder %s39_s18, %s2399_s26  ;;  %p2405_p5 = scmp.lt.s32.totalorder %s2399_s26, %s2399_s26 }
   0xe   :  { %p2406_p6 = por %p2405_p5, %p2404_p4 }
  0x10   :  { %p2407_p7 = pnand %p2406_p6, %p2400_p3 }
  0x12   :  { %2410 = shalt.err (!%p2407_p7)
}
  0x13   :  { %s2576_s27 = smov 256   ;;  %s2577_s28 = smov 16  }
  0x14   :  { %44 = dma.hbm_to_vmem [thread:$0]  %s3125_s1, 3072, %s39_s18, [#allocation7], %s2576_s27, %s2576_s27, %s2577_s28  }
  0x15   :  { %s2578_s12 = smov [#allocation9]   ;;  %s2411_s16 = scalar_lea.hbm %s3127_s3, 5120 }
  0x16   :  { %s62_s13 = sshll.u32 %s2578_s12, 4  ;;  %p2412_p8 = scmp.ne.s32.totalorder %s3127_s3, %s2411_s16  ;;  %s63_s13 = int_to_ptr.vmem [resolvable:$true] %s62_s13 }
  0x17   :  { %p2415_p9 = scmp.lt.u32.totalorder %s2411_s16, %s3127_s3 }
  0x19   :  { %p2417_p10 = pnand %p2415_p9, %p2412_p8 }
  0x1b   :  { %2420 = shalt.err (!%p2417_p10)
}
  0x1c   :  { %s2421_s22 = scalar_lea.vmem %s63_s13, 5120  ;;  %p2426_p12 = scmp.lt.s32.totalorder %s63_s13, %s63_s13 }
  0x1d   :  { %p2422_p11 = scmp.ne.s32.totalorder %s63_s13, %s2421_s22  ;;  %p2427_p13 = scmp.lt.s32.totalorder %s2421_s22, %s2421_s22 }
  0x1f   :  { %p2428_p0 = por %p2427_p13, %p2426_p12 }
  0x21   :  { %p2429_p1 = pnand %p2428_p0, %p2422_p11 }
  0x23   :  { %2432 = shalt.err (!%p2429_p1)
}
  0x24   :  { %68 = dma.hbm_to_vmem [thread:$0]  %s3127_s3, 5120, %s63_s13, [#allocation10], %s2576_s27, %s2576_s27, %s2577_s28  }
  0x25   :  { %s2579_s23 = smov [#allocation12]   ;;  %s2580_s25 = smov [#allocation3]  }
  0x26   :  { %s90_s24 = sshll.u32 %s2579_s23, 4  ;;  %s26_s26 = sshll.u32 %s2580_s25, 4  ;;  %s91_s24 = int_to_ptr.vmem [resolvable:$true] %s90_s24  ;;  %s2685_s26 = int_to_ptr.vmem [resolvable:$true] %s26_s26 }
  0x27   :  { %s2433_s12 = scalar_lea.hbm %s3131_s7, 4096 }
  0x28   :  { %p2434_p2 = scmp.ne.s32.totalorder %s3131_s7, %s2433_s12  ;;  %p2437_p3 = scmp.lt.u32.totalorder %s2433_s12, %s3131_s7 }
  0x2a   :  { %p2439_p4 = pnand %p2437_p3, %p2434_p2 }
  0x2c   :  { %2442 = shalt.err (!%p2439_p4)
}
  0x2d   :  { %s2443_s3 = scalar_lea.vmem %s91_s24, 4096  ;;  %p2448_p6 = scmp.lt.s32.totalorder %s91_s24, %s91_s24 }
  0x2e   :  { %p2444_p5 = scmp.ne.s32.totalorder %s91_s24, %s2443_s3  ;;  %p2449_p7 = scmp.lt.s32.totalorder %s2443_s3, %s2443_s3 }
  0x30   :  { %p2450_p8 = por %p2449_p7, %p2448_p6 }
  0x32   :  { %p2451_p9 = pnand %p2450_p8, %p2444_p5 }
  0x34   :  { %2454 = shalt.err (!%p2451_p9)
}
  0x35   :  { %s2581_s13 = smov 128   ;;  %s2582_s19 = smov 8  }
  0x36   :  { %96 = dma.hbm_to_vmem [thread:$0]  %s3131_s7, 4096, %s91_s24, [#allocation13], %s2581_s13, %s2581_s13, %s2582_s19  }
  0x37   :  { %s2455_s18 = scalar_lea.hbm %s3124_s0, 512 }
  0x38   :  { %p2456_p10 = scmp.ne.s32.totalorder %s3124_s0, %s2455_s18  ;;  %p2459_p11 = scmp.lt.u32.totalorder %s2455_s18, %s3124_s0 }
  0x3a   :  { %p2461_p12 = pnand %p2459_p11, %p2456_p10 }
  0x3c   :  { %2464 = shalt.err (!%p2461_p12)
}
  0x3d   :  { %s2465_s12 = scalar_lea.vmem %s2685_s26, 512  ;;  %p2470_p0 = scmp.lt.s32.totalorder %s2685_s26, %s2685_s26 }
  0x3e   :  { %p2466_p13 = scmp.ne.s32.totalorder %s2685_s26, %s2465_s12  ;;  %p2471_p1 = scmp.lt.s32.totalorder %s2465_s12, %s2465_s12 }
  0x40   :  { %p2472_p2 = por %p2471_p1, %p2470_p0 }
  0x42   :  { %p2473_p3 = pnand %p2472_p2, %p2466_p13 }
  0x44   :  { %2476 = shalt.err (!%p2473_p3)
}
  0x45   :  { %32 = dma.hbm_to_vmem [thread:$0]  %s3124_s0, 512, %s2685_s26, [#allocation4], %s2581_s13, %s2581_s13, %s2582_s19  }
  0x46   :  { %s2583_s14 = smov [#allocation8]   ;;  %s2584_s16 = smov [#allocation11]  }
  0x47   :  { %s50_s15 = sshll.u32 %s2583_s14, 4  ;;  %s76_s17 = sshll.u32 %s2584_s16, 4  ;;  %s51_s15 = int_to_ptr.vmem [resolvable:$true] %s50_s15  ;;  %s2722_s17 = int_to_ptr.vmem [resolvable:$true] %s76_s17 }
  0x48   :  { %s2477_s21 = scalar_lea.hbm %s3126_s2, 4096 }
  0x49   :  { %p2478_p4 = scmp.ne.s32.totalorder %s3126_s2, %s2477_s21  ;;  %p2481_p5 = scmp.lt.u32.totalorder %s2477_s21, %s3126_s2 }
  0x4b   :  { %p2483_p6 = pnand %p2481_p5, %p2478_p4 }
  0x4d   :  { %2486 = shalt.err (!%p2483_p6)
}
  0x4e   :  { %s2487_s0 = scalar_lea.vmem %s51_s15, 4096  ;;  %p2492_p8 = scmp.lt.s32.totalorder %s51_s15, %s51_s15 }
  0x4f   :  { %p2488_p7 = scmp.ne.s32.totalorder %s51_s15, %s2487_s0  ;;  %p2493_p9 = scmp.lt.s32.totalorder %s2487_s0, %s2487_s0 }
  0x51   :  { %p2494_p10 = por %p2493_p9, %p2492_p8 }
  0x53   :  { %p2495_p11 = pnand %p2494_p10, %p2488_p7 }
  0x55   :  { %2498 = shalt.err (!%p2495_p11)
}
  0x56   :  { %56 = dma.hbm_to_vmem [thread:$0]  %s3126_s2, 4096, %s51_s15, [#allocation7], %s2576_s27, %s2576_s27, %s2577_s28  }
  0x57   :  { %s2499_s12 = scalar_lea.hbm %s3129_s5, 24576 }
  0x58   :  { %p2500_p12 = scmp.ne.s32.totalorder %s3129_s5, %s2499_s12  ;;  %p2503_p13 = scmp.lt.u32.totalorder %s2499_s12, %s3129_s5 }
  0x5a   :  { %p2505_p0 = pnand %p2503_p13, %p2500_p12 }
  0x5c   :  { %2508 = shalt.err (!%p2505_p0)
}
  0x5d   :  { %s2509_s3 = scalar_lea.vmem %s2722_s17, 24576  ;;  %p2514_p2 = scmp.lt.s32.totalorder %s2722_s17, %s2722_s17 }
  0x5e   :  { %p2510_p1 = scmp.ne.s32.totalorder %s2722_s17, %s2509_s3  ;;  %p2515_p3 = scmp.lt.s32.totalorder %s2509_s3, %s2509_s3 }
  0x60   :  { %p2516_p4 = por %p2515_p3, %p2514_p2 }
  0x62   :  { %p2517_p5 = pnand %p2516_p4, %p2510_p1 }
  0x64   :  { %2520 = shalt.err (!%p2517_p5)
}
  0x65   :  { %82 = dma.hbm_to_vmem [thread:$0]  %s3129_s5, 24576, %s2722_s17, [#allocation10], %s2576_s27, %s2576_s27, %s2577_s28  }
  0x66   :  { %s2585_s20 = smov [#allocation14]   ;;  %s2521_s18 = scalar_lea.hbm %s3133_s9, 2048 }
  0x67   :  { %s104_s21 = sshll.u32 %s2585_s20, 4  ;;  %p2522_p6 = scmp.ne.s32.totalorder %s3133_s9, %s2521_s18  ;;  %s105_s21 = int_to_ptr.vmem [resolvable:$true] %s104_s21 }
  0x68   :  { %p2525_p7 = scmp.lt.u32.totalorder %s2521_s18, %s3133_s9 }
  0x6a   :  { %p2527_p8 = pnand %p2525_p7, %p2522_p6 }
  0x6c   :  { %2530 = shalt.err (!%p2527_p8)
}
  0x6d   :  { %s2531_s29 = scalar_lea.vmem %s105_s21, 2048  ;;  %p2536_p10 = scmp.lt.s32.totalorder %s105_s21, %s105_s21 }
  0x6e   :  { %p2532_p9 = scmp.ne.s32.totalorder %s105_s21, %s2531_s29  ;;  %p2537_p11 = scmp.lt.s32.totalorder %s2531_s29, %s2531_s29 }
  0x70   :  { %p2538_p12 = por %p2537_p11, %p2536_p10 }
  0x72   :  { %p2539_p13 = pnand %p2538_p12, %p2532_p9 }
  0x74   :  { %2542 = shalt.err (!%p2539_p13)
}
  0x75   :  { %110 = dma.hbm_to_vmem [thread:$0]  %s3133_s9, 2048, %s105_s21, [#allocation13], %s2581_s13, %s2581_s13, %s2582_s19  }
  0x76   :  { %2565 = dma.done.wait [#allocation4], 512  }
  0x77   :  { %2566 = vsyncadd [#allocation4], 4294966784 }
  0x78   :  { %2567 = dma.done.wait [#allocation7], 7168  }
  0x79   :  { %2568 = vsyncadd [#allocation7], 4294960128 }
  0x7a   :  { %2569 = dma.done.wait [#allocation10], 29696  }
  0x7b   :  { %2570 = vsyncadd [#allocation10], 4294937600 }
  0x7c   :  { %2571 = dma.done.wait [#allocation13], 6144  }
  0x7d   :  { %2572 = vsyncadd [#allocation13], 4294961152  ;;  %v2586_v0 = vmov 0.0   ;;  %v2776_v1 = vld [vmem:[#allocation3] sm:$0xff]  ;;  %v2778_v2 = vld [vmem:[#allocation3 + $0x8] sm:$0xff]  ;;  %vm138_vm0 = vcmask 1046528  }
  0x7e   :  { %259 = vmatprep.mubr.f32.mxu0 %v2586_v0  ;;  %396 = vmatprep.mubr.f32.mxu1 %v2586_v0  ;;  %vm288_vm1 = vcmask 1044480   ;;  %v139_v3 = vrot.slane %v2776_v1, 1  ;;  %v140_v4 = vrot.slane %v2778_v2, 1  ;;  %v289_v5 = vrot.slane %v2776_v1, 3  ;;  %v301_v9 = vld [vmem:[#allocation8 + $0x8] sm:$0xff]  ;;  %v303_v10 = vld [vmem:[#allocation8 + $0x18] sm:$0xff] }
  0x7f   :  { %v290_v6 = vrot.slane %v2778_v2, 3  ;;  %vm148_vm2 = vcmask 1045504   ;;  %v149_v7 = vrot.slane %v2776_v1, 2  ;;  %v150_v8 = vrot.slane %v2778_v2, 2  ;;  %v300_v11 = vld [vmem:[#allocation8] sm:$0xff]  ;;  %v302_v14 = vld [vmem:[#allocation8 + $0x10] sm:$0xff] }
  0x80   :  { %v141_v12 = vsel %vm138_vm0, %v139_v3, %v140_v4  ;;  %v305_v15 = vld [vmem:[#allocation8 + $0x28] sm:$0xff]  ;;  %v307_v16 = vld [vmem:[#allocation8 + $0x38] sm:$0xff]  ;;  %s2587_s9 = smov 32   ;;  %s2588_s28 = smov 96   ;;  %v2790_v17 = vld [vmem:[#allocation3 + $0x10] sm:$0xff]  ;;  %v2795_v21 = vpack.c.bf16 %v303_v10, %v301_v9  ;;  %v2797_v22 = vpack.c.bf16 %v302_v14, %v300_v11  ;;  %vm158_vm3 = vcmask 261120  }
  0x81   :  { %v291_v13 = vsel %vm288_vm1, %v289_v5, %v290_v6  ;;  %142 = vrot.lane.b32.xlu0 %v141_v12, %s2587_s9  ;;  %v2792_v18 = vld [vmem:[#allocation3 + $0x18] sm:$0xff]  ;;  %v165_v19 = vld [vmem:[#allocation6 + $0x8] sm:$0xff]  ;;  %v151_v20 = vsel %vm148_vm2, %v149_v7, %v150_v8  ;;  %v164_v24 = vld [vmem:[#allocation6] sm:$0xff]  ;;  %v2799_v26 = vpack.c.bf16 %v307_v16, %v305_v15  ;;  %s2589_s13 = smov 64   ;;  %v623_v35 = vrot.slane %v2790_v17, 1  ;;  %s2594_s14 = smov [#allocation15]  }
  0x82   :  { %292 = vrot.lane.b32.xlu1 %v291_v13, %s2588_s28  ;;  %v167_v23 = vld [vmem:[#allocation6 + $0x18] sm:$0xff]  ;;  %v166_v25 = vld [vmem:[#allocation6 + $0x10] sm:$0xff]  ;;  %v304_v27 = vld [vmem:[#allocation8 + $0x20] sm:$0xff]  ;;  %1948 = vmatprep.subr.bf16.mxu1 %v2795_v21  ;;  %v624_v39 = vrot.slane %v2792_v18, 1  ;;  %v632_v40 = vrot.slane %v2790_v17, 2  ;;  %v633_v41 = vrot.slane %v2792_v18, 2 }
  0x83   :  { %v306_v28 = vld [vmem:[#allocation8 + $0x30] sm:$0xff]  ;;  %v2801_v29 = vpack.c.bf16 %v167_v23, %v165_v19  ;;  %v2803_v30 = vpack.c.bf16 %v166_v25, %v164_v24  ;;  %v309_v31 = vld [vmem:[#allocation8 + $0x48] sm:$0xff]  ;;  %v311_v32 = vld [vmem:[#allocation8 + $0x58] sm:$0xff]  ;;  %1950 = vmatpush1.bf16.msra.mxu1 %v2797_v22  ;;  %v768_v9 = vrot.slane %v2790_v17, 3  ;;  %v769_v10 = vrot.slane %v2792_v18, 3  ;;  %s1814_s16 = sshll.u32 %s2594_s14, 4  ;;  %s1815_s16 = int_to_ptr.vmem [resolvable:$true] %s1814_s16 }
  0x84   :  { %v169_v33 = vld [vmem:[#allocation6 + $0x28] sm:$0xff]  ;;  %v171_v34 = vld [vmem:[#allocation6 + $0x38] sm:$0xff]  ;;  %v168_v37 = vld [vmem:[#allocation6 + $0x20] sm:$0xff]  ;;  %v2815_v42 = vpack.c.bf16 %v306_v28, %v304_v27  ;;  %1952 = vmatprep.subr.bf16.mxu1 %v2799_v26  ;;  %v2820_v45 = vpack.c.bf16 %v311_v32, %v309_v31  ;;  %v625_v55 = vsel %vm138_vm0, %v623_v35, %v624_v39  ;;  %v634_v56 = vsel %vm148_vm2, %v632_v40, %v633_v41  ;;  %s2543_s3 = scalar_lea.vmem %s1815_s16, 32  ;;  %p2548_p1 = scmp.lt.s32.totalorder %s1815_s16, %s1815_s16 }
  0x85   :  { %152 = vrot.lane.b32.xlu0 %v151_v20, %s2589_s13  ;;  %v2809_v36 = vpack.c.bf16 %v171_v34, %v169_v33  ;;  %v170_v38 = vld [vmem:[#allocation6 + $0x30] sm:$0xff]  ;;  %1924 = vmatprep.subr.bf16.mxu0 %v2801_v29  ;;  %v308_v43 = vld [vmem:[#allocation8 + $0x40] sm:$0xff]  ;;  %v313_v47 = vld [vmem:[#allocation8 + $0x68] sm:$0xff]  ;;  %v770_v28 = vsel %vm288_vm1, %v768_v9, %v769_v10  ;;  %vm161_vm4 = vcmask 523264   ;;  %vm188_vm5 = vcmask 785408   ;;  %p2544_p0 = scmp.ne.s32.totalorder %s1815_s16, %s2543_s3  ;;  %p2549_p2 = scmp.lt.s32.totalorder %s2543_s3, %s2543_s3 }
  0x86   :  { %144 = vrot.lane.b32.xlu1 %v140_v4, %s2587_s9  ;;  %v310_v44 = vld [vmem:[#allocation8 + $0x50] sm:$0xff]  ;;  %1926 = vmatpush1.bf16.msra.mxu0 %v2803_v30  ;;  %v2822_v46 = vpack.c.bf16 %v170_v38, %v168_v37  ;;  %v173_v48 = vld [vmem:[#allocation6 + $0x48] sm:$0xff]  ;;  %v175_v49 = vld [vmem:[#allocation6 + $0x58] sm:$0xff]  ;;  %vm425_vm6 = vcmask 1043456   ;;  %vm2593_vm8 = vmmov 0  }
  0x87   :  { %1928 = vmatprep.subr.bf16.mxu0 %v2809_v36  ;;  %v315_v50 = vld [vmem:[#allocation8 + $0x78] sm:$0xff]  ;;  %v2825_v51 = vpack.c.bf16 %v175_v49, %v173_v48  ;;  %v172_v52 = vld [vmem:[#allocation6 + $0x40] sm:$0xff]  ;;  %v174_v53 = vld [vmem:[#allocation6 + $0x50] sm:$0xff]  ;;  %1954 = vmatpush1.bf16.msra.mxu1 %v2815_v42  ;;  %v2832_v57 = vpack.c.bf16 %v310_v44, %v308_v43  ;;  %p2550_p3 = por %p2549_p2, %p2548_p1 }
  0x88   :  { %v177_v54 = vld [vmem:[#allocation6 + $0x68] sm:$0xff]  ;;  %v179_v58 = vld [vmem:[#allocation6 + $0x78] sm:$0xff]  ;;  %1956 = vmatprep.subr.bf16.mxu1 %v2820_v45  ;;  %v2836_v59 = vpack.c.bf16 %v315_v50, %v313_v47  ;;  %v312_v60 = vld [vmem:[#allocation8 + $0x60] sm:$0xff]  ;;  %v2838_v62 = vpack.c.bf16 %v174_v53, %v172_v52 }
  0x89   :  { %154 = vrot.lane.b32.xlu0 %v150_v8, %s2589_s13  ;;  %v314_v61 = vld [vmem:[#allocation8 + $0x70] sm:$0xff]  ;;  %v317_v63 = vld [vmem:[#allocation8 + $0x88] sm:$0xff]  ;;  %v319_v3 = vld [vmem:[#allocation8 + $0x98] sm:$0xff]  ;;  %v2841_v4 = vpack.c.bf16 %v179_v58, %v177_v54  ;;  %p2551_p4 = pnand %p2550_p3, %p2544_p0 }
  0x8a   :  { %294 = vrot.lane.b32.xlu1 %v290_v6, %s2588_s28  ;;  %1930 = vmatpush1.bf16.msra.mxu0 %v2822_v46  ;;  %v176_v5 = vld [vmem:[#allocation6 + $0x60] sm:$0xff]  ;;  %v178_v6 = vld [vmem:[#allocation6 + $0x70] sm:$0xff]  ;;  %v181_v7 = vld [vmem:[#allocation6 + $0x88] sm:$0xff]  ;;  %v2848_v11 = vpack.c.bf16 %v314_v61, %v312_v60  ;;  %v2852_v12 = vpack.c.bf16 %v319_v3, %v317_v63 }
  0x8b   :  { %1932 = vmatprep.subr.bf16.mxu0 %v2825_v51  ;;  %v183_v8 = vld [vmem:[#allocation6 + $0x98] sm:$0xff]  ;;  %1958 = vmatpush1.bf16.msra.mxu1 %v2832_v57  ;;  %v316_v13 = vld [vmem:[#allocation8 + $0x80] sm:$0xff]  ;;  %v318_v14 = vld [vmem:[#allocation8 + $0x90] sm:$0xff]  ;;  %v2854_v15 = vpack.c.bf16 %v178_v6, %v176_v5 }
  0x8c   :  { %1960 = vmatprep.subr.bf16.mxu1 %v2836_v59  ;;  %v321_v16 = vld [vmem:[#allocation8 + $0xa8] sm:$0xff]  ;;  %v323_v19 = vld [vmem:[#allocation8 + $0xb8] sm:$0xff]  ;;  %v2857_v20 = vpack.c.bf16 %v183_v8, %v181_v7  ;;  %v180_v23 = vld [vmem:[#allocation6 + $0x80] sm:$0xff]  ;;  %v2863_v31 = vpack.c.bf16 %v318_v14, %v316_v13 }
  0x8d   :  { %626 = vrot.lane.b32.xlu0 %v625_v55, %s2587_s9  ;;  %v182_v24 = vld [vmem:[#allocation6 + $0x90] sm:$0xff]  ;;  %v185_v25 = vld [vmem:[#allocation6 + $0xa8] sm:$0xff]  ;;  %v187_v27 = vld [vmem:[#allocation6 + $0xb8] sm:$0xff]  ;;  %v2867_v32 = vpack.c.bf16 %v323_v19, %v321_v16 }
  0x8e   :  { %635 = vrot.lane.b32.xlu1 %v634_v56, %s2589_s13  ;;  %1934 = vmatpush1.bf16.msra.mxu0 %v2838_v62  ;;  %v320_v33 = vld [vmem:[#allocation8 + $0xa0] sm:$0xff]  ;;  %v322_v34 = vld [vmem:[#allocation8 + $0xb0] sm:$0xff]  ;;  %v2869_v35 = vpack.c.bf16 %v182_v24, %v180_v23  ;;  %v325_v37 = vld [vmem:[#allocation8 + $0xc8] sm:$0xff] }
  0x8f   :  { %1936 = vmatprep.subr.bf16.mxu0 %v2841_v4  ;;  %1962 = vmatpush1.bf16.msra.mxu1 %v2848_v11  ;;  %v327_v38 = vld [vmem:[#allocation8 + $0xd8] sm:$0xff]  ;;  %v184_v40 = vld [vmem:[#allocation6 + $0xa0] sm:$0xff]  ;;  %v430_v43 = vld [vmem:[#allocation9 + $0x8] sm:$0xff]  ;;  %v2877_v47 = vpack.c.bf16 %v322_v34, %v320_v33 }
  0x90   :  { %1964 = vmatprep.subr.bf16.mxu1 %v2852_v12  ;;  %v432_v44 = vld [vmem:[#allocation9 + $0x18] sm:$0xff]  ;;  %v2881_v48 = vpack.c.bf16 %v327_v38, %v325_v37  ;;  %v324_v49 = vld [vmem:[#allocation8 + $0xc0] sm:$0xff]  ;;  %v326_v50 = vld [vmem:[#allocation8 + $0xd0] sm:$0xff]  ;;  %v426_v37 = vrot.slane %v2776_v1, 4  ;;  %v427_v38 = vrot.slane %v2778_v2, 4 }
  0x91   :  { %628 = vrot.lane.b32.xlu0 %v624_v39, %s2587_s9  ;;  %v2872_v39 = vpack.c.bf16 %v187_v27, %v185_v25  ;;  %v329_v53 = vld [vmem:[#allocation8 + $0xe8] sm:$0xff]  ;;  %v331_v54 = vld [vmem:[#allocation8 + $0xf8] sm:$0xff]  ;;  %v2886_v55 = vpack.c.bf16 %v432_v44, %v430_v43  ;;  %v2889_v56 = vpack.c.bf16 %v326_v50, %v324_v49  ;;  %v328_v60 = vld [vmem:[#allocation8 + $0xe0] sm:$0xff] }
  0x92   :  { %637 = vrot.lane.b32.xlu1 %v633_v41, %s2589_s13  ;;  %1938 = vmatpush1.bf16.msra.mxu0 %v2854_v15  ;;  %v186_v41 = vld [vmem:[#allocation6 + $0xb0] sm:$0xff]  ;;  %v2893_v58 = vpack.c.bf16 %v331_v54, %v329_v53  ;;  %v429_v6 = vld [vmem:[#allocation9] sm:$0xff]  ;;  %v434_v8 = vld [vmem:[#allocation9 + $0x28] sm:$0xff] }
  0x93   :  { %1940 = vmatprep.subr.bf16.mxu0 %v2857_v20  ;;  %1966 = vmatpush1.bf16.msra.mxu1 %v2863_v31  ;;  %v2883_v52 = vpack.c.bf16 %v186_v41, %v184_v40  ;;  %v330_v61 = vld [vmem:[#allocation8 + $0xf0] sm:$0xff]  ;;  %v436_v9 = vld [vmem:[#allocation9 + $0x38] sm:$0xff]  ;;  %v433_v19 = vld [vmem:[#allocation9 + $0x20] sm:$0xff] }
  0x94   :  { %1968 = vmatprep.subr.bf16.mxu1 %v2867_v32  ;;  %v2897_v63 = vpack.c.bf16 %v330_v61, %v328_v60  ;;  %v431_v7 = vld [vmem:[#allocation9 + $0x10] sm:$0xff]  ;;  %v2907_v24 = vpack.c.bf16 %v436_v9, %v434_v8  ;;  %v438_v25 = vld [vmem:[#allocation9 + $0x48] sm:$0xff]  ;;  %v440_v27 = vld [vmem:[#allocation9 + $0x58] sm:$0xff]  ;;  %v428_v60 = vsel %vm425_vm6, %v426_v37, %v427_v38 }
  0x95   :  { %771 = vrot.lane.b32.xlu0 %v770_v28, %s2588_s28  ;;  %v435_v23 = vld [vmem:[#allocation9 + $0x30] sm:$0xff]  ;;  %v2923_v43 = vpack.c.bf16 %v440_v27, %v438_v25  ;;  %v437_v44 = vld [vmem:[#allocation9 + $0x40] sm:$0xff]  ;;  %v444_v53 = vld [vmem:[#allocation9 + $0x78] sm:$0xff] }
  0x96   :  { %773 = vrot.lane.b32.xlu1 %v769_v10, %s2588_s28  ;;  %1942 = vmatpush1.bf16.msra.mxu0 %v2869_v35  ;;  %v2902_v10 = vpack.c.bf16 %v431_v7, %v429_v6  ;;  %v2917_v34 = vpack.c.bf16 %v435_v23, %v433_v19  ;;  %v439_v49 = vld [vmem:[#allocation9 + $0x50] sm:$0xff]  ;;  %v448_v6 = vld [vmem:[#allocation9 + $0x98] sm:$0xff]  ;;  %v445_v8 = vld [vmem:[#allocation9 + $0x80] sm:$0xff] }
  0x97   :  { %1944 = vmatprep.subr.bf16.mxu0 %v2872_v39  ;;  %1970 = vmatpush1.bf16.msra.mxu1 %v2877_v47  ;;  %v2935_v54 = vpack.c.bf16 %v439_v49, %v437_v44  ;;  %v447_v9 = vld [vmem:[#allocation9 + $0x90] sm:$0xff]  ;;  %v454_v23 = vld [vmem:[#allocation9 + $0xc8] sm:$0xff]  ;;  %v453_v27 = vld [vmem:[#allocation9 + $0xc0] sm:$0xff] }
  0x98   :  { %1972 = vmatprep.subr.bf16.mxu1 %v2881_v48  ;;  %v451_v19 = vld [vmem:[#allocation9 + $0xb0] sm:$0xff] }
  0x9a   :  { %1946 = vmatpush1.bf16.msra.mxu0 %v2883_v52 }
  0x9b   :  { %1980 = vmatprep.subr.bf16.mxu0 %v2886_v55  ;;  %1974 = vmatpush1.bf16.msra.mxu1 %v2889_v56 }
  0x9c   :  { %1976 = vmatprep.subr.bf16.mxu1 %v2893_v58 }
  0x9f   :  { %1978 = vmatpush1.bf16.msra.mxu1 %v2897_v63 }
  0xa0   :  { %2020 = vmatprep.subr.bf16.mxu1 %v2801_v29 }
  0xf3   :  { %v143_v3 = vpop.permute.xlu0 %142 }
  0xf4   :  { %v293_v5 = vpop.permute.xlu1 %292  ;;  %v159_v13 = vsel %vm158_vm3, %v2776_v1, %v143_v3  ;;  %v442_v1 = vld [vmem:[#allocation9 + $0x68] sm:$0xff]  ;;  %v443_v3 = vld [vmem:[#allocation9 + $0x70] sm:$0xff] }
  0xf5   :  { %v2942_v61 = vpack.c.bf16 %v444_v53, %v442_v1  ;;  %v459_v1 = vld [vmem:[#allocation9 + $0xf0] sm:$0xff]  ;;  %v462_v53 = vld [vmem:[#allocation9 + $0x108] sm:$0xff] }
  0xf7   :  { %v153_v14 = vpop.permute.xlu0 %152 }
  0xf8   :  { %v145_v16 = vpop.permute.xlu1 %144  ;;  %v162_v29 = vsel %vm161_vm4, %v159_v13, %v153_v14  ;;  %v452_v13 = vld [vmem:[#allocation9 + $0xb8] sm:$0xff]  ;;  %v2956_v14 = vpack.c.bf16 %v447_v9, %v445_v8  ;;  %v466_v9 = vld [vmem:[#allocation9 + $0x128] sm:$0xff] }
  0xf9   :  { %v160_v28 = vsel %vm158_vm3, %v2778_v2, %v145_v16  ;;  %1826 = vmatmul.mubr.msk.f32.vlgmr.msra.gmra.mrb[0].mxu0 %vm188_vm5, %v162_v29  ;;  %v2913_v33 = vsel %vm188_vm5, %v162_v29, %v293_v5  ;;  %v446_v5 = vld [vmem:[#allocation9 + $0x88] sm:$0xff]  ;;  %v456_v29 = vld [vmem:[#allocation9 + $0xd8] sm:$0xff] }
  0xfa   :  { %1982 = vmatpush1.bf16.msra.mxu0 %v2902_v10  ;;  %397 = vmatmul.mubr.f32.vlgmr.msra.gmra.mrb[0].mxu1 %v2913_v33 }
  0xfb   :  { %2022 = vmatpush1.bf16.msra.mxu1 %v2803_v30  ;;  %v155_v40 = vpop.permute.xlu0 %154  ;;  %265 = vmatprep.mubr.f32.mxu0 %v2586_v0 }
  0xfc   :  { %v295_v41 = vpop.permute.xlu1 %294  ;;  %v163_v50 = vsel %vm161_vm4, %v160_v28, %v155_v40  ;;  %1984 = vmatprep.subr.bf16.mxu0 %v2907_v24  ;;  %402 = vmatprep.mubr.f32.mxu1 %v2586_v0  ;;  %v455_v28 = vld [vmem:[#allocation9 + $0xd0] sm:$0xff]  ;;  %v458_v40 = vld [vmem:[#allocation9 + $0xe8] sm:$0xff] }
  0xfd   :  { %1827 = vmatmul.mubr.msk.f32.gmra.mrb[2].mxu0 %vm188_vm5, %v163_v50  ;;  %2024 = vmatprep.subr.bf16.mxu1 %v2809_v36  ;;  %v2931_v30 = vsel %vm188_vm5, %v163_v50, %v295_v41  ;;  %v441_v36 = vld [vmem:[#allocation9 + $0x60] sm:$0xff]  ;;  %v460_v41 = vld [vmem:[#allocation9 + $0xf8] sm:$0xff]  ;;  %v2974_v49 = vpack.c.bf16 %v455_v28, %v453_v27  ;;  %v1162_v27 = vld [vmem:[#allocation11 + $0x50] sm:$0xff] }
  0xfe   :  { %1986 = vmatpush1.bf16.msra.mxu0 %v2917_v34  ;;  %403 = vmatmul.mubr.f32.gmra.mrb[2].mxu1 %v2931_v30  ;;  %v2948_v7 = vpack.c.bf16 %v443_v3, %v441_v36  ;;  %v2981_v50 = vpack.c.bf16 %v460_v41, %v458_v40  ;;  %v1225_v28 = vld [vmem:[#allocation11 + $0x248] sm:$0xff]  ;;  %v1224_v40 = vld [vmem:[#allocation11 + $0x240] sm:$0xff]  ;;  %v1226_v41 = vld [vmem:[#allocation11 + $0x250] sm:$0xff] }
  0xff   :  { %2026 = vmatpush1.bf16.msra.mxu1 %v2822_v46  ;;  %1988 = vmatprep.subr.bf16.mxu0 %v2923_v43  ;;  %v2952_v46 = vpack.c.bf16 %v448_v6, %v446_v5  ;;  %v627_v25 = vpop.permute.xlu0 %626  ;;  %v461_v6 = vld [vmem:[#allocation9 + $0x100] sm:$0xff] }
 0x100   :  { %2028 = vmatprep.subr.bf16.mxu1 %v2825_v51  ;;  %739 = vmatprep.mubr.f32.mxu1 %v2586_v0  ;;  %v450_v51 = vld [vmem:[#allocation9 + $0xa8] sm:$0xff]  ;;  %v636_v37 = vpop.permute.xlu1 %635 }
 0x101   :  { %1828 = vmatprep.mubr.msk.f32.mxu0 %vm158_vm3, %v428_v60  ;;  %v2960_v16 = vpack.c.bf16 %v452_v13, %v450_v51  ;;  %v464_v60 = vld [vmem:[#allocation9 + $0x118] sm:$0xff] }
 0x102   :  { %1990 = vmatpush1.bf16.msra.mxu0 %v2935_v54  ;;  %v2011_v5 = vpack.c.bf16 %v464_v60, %v462_v53  ;;  %v468_v51 = vld [vmem:[#allocation9 + $0x138] sm:$0xff]  ;;  %v1166_v53 = vld [vmem:[#allocation11 + $0x70] sm:$0xff]  ;;  %v1229_v60 = vld [vmem:[#allocation11 + $0x268] sm:$0xff] }
 0x103   :  { %2030 = vmatpush1.bf16.msra.mxu1 %v2838_v62  ;;  %1992 = vmatprep.subr.bf16.mxu0 %v2942_v61  ;;  %v449_v62 = vld [vmem:[#allocation9 + $0xa0] sm:$0xff]  ;;  %v629_v44 = vpop.permute.xlu0 %628 }
 0x104   :  { %2032 = vmatprep.subr.bf16.mxu1 %v2841_v4  ;;  %v2964_v4 = vpack.c.bf16 %v451_v19, %v449_v62  ;;  %v642_v36 = vsel %vm158_vm3, %v2792_v18, %v629_v44  ;;  %v638_v3 = vpop.permute.xlu1 %637  ;;  %v465_v62 = vld [vmem:[#allocation9 + $0x120] sm:$0xff]  ;;  %v467_v19 = vld [vmem:[#allocation9 + $0x130] sm:$0xff] }
 0x105   :  { %v644_v8 = vsel %vm161_vm4, %v642_v36, %v638_v3  ;;  %v1231_v3 = vld [vmem:[#allocation11 + $0x278] sm:$0xff] }
 0x106   :  { %1994 = vmatpush1.bf16.msra.mxu0 %v2948_v7 }
 0x107   :  { %2034 = vmatpush1.bf16.msra.mxu1 %v2854_v15  ;;  %1996 = vmatprep.subr.bf16.mxu0 %v2952_v46  ;;  %v2968_v15 = vpack.c.bf16 %v456_v29, %v454_v23  ;;  %v905_v23 = vrot.slane %v2792_v18, 4  ;;  %v772_v2 = vpop.permute.xlu0 %771  ;;  %v1161_v29 = vld [vmem:[#allocation11 + $0x48] sm:$0xff] }
 0x108   :  { %2036 = vmatprep.subr.bf16.mxu1 %v2857_v20  ;;  %v641_v20 = vsel %vm158_vm3, %v2790_v17, %v627_v25  ;;  %v1163_v25 = vld [vmem:[#allocation11 + $0x58] sm:$0xff] }
 0x10a   :  { %1998 = vmatpush1.bf16.msra.mxu0 %v2956_v14 }
 0x10b   :  { %2038 = vmatpush1.bf16.msra.mxu1 %v2869_v35  ;;  %2000 = vmatprep.subr.bf16.mxu0 %v2960_v16  ;;  %v2978_v35 = vsel %vm161_vm4, %v641_v20, %v636_v37  ;;  %v1227_v37 = vld [vmem:[#allocation11 + $0x258] sm:$0xff] }
 0x10c   :  { %2040 = vmatprep.subr.bf16.mxu1 %v2872_v39  ;;  %v457_v39 = vld [vmem:[#allocation9 + $0xe0] sm:$0xff]  ;;  %v777_v18 = vsel %vm188_vm5, %v2978_v35, %v772_v2  ;;  %v2187_v44 = vpack.c.bf16 %v1227_v37, %v1225_v28 }
 0x10d   :  { %v1244_v28 = vld [vmem:[#allocation11 + $0x2e0] sm:$0xff] }
 0x10e   :  { %2002 = vmatpush1.bf16.msra.mxu0 %v2964_v4 }
 0x10f   :  { %2042 = vmatpush1.bf16.msra.mxu1 %v2883_v52  ;;  %2004 = vmatprep.subr.bf16.mxu0 %v2968_v15  ;;  %v2989_v52 = vpack.c.bf16 %v459_v1, %v457_v39  ;;  %v1164_v1 = vld [vmem:[#allocation11 + $0x60] sm:$0xff] }
 0x110   :  { %2044 = vmatprep.subr.bf16.mxu1 %v2795_v21  ;;  %v463_v21 = vld [vmem:[#allocation9 + $0x110] sm:$0xff]  ;;  %v2129_v36 = vpack.c.bf16 %v1166_v53, %v1164_v1  ;;  %v1251_v53 = vld [vmem:[#allocation11 + $0x318] sm:$0xff] }
 0x111   :  { %v2013_v13 = vpack.c.bf16 %v463_v21, %v461_v6  ;;  %v2191_v6 = vpack.c.bf16 %v1231_v3, %v1229_v60  ;;  %v1248_v60 = vld [vmem:[#allocation11 + $0x300] sm:$0xff] }
 0x112   :  { %2006 = vmatpush1.bf16.msra.mxu0 %v2974_v49  ;;  %1830 = vmatmul.mubr.msk.f32.vlgmr.msra.gmra.mrb[4].mxu1 %vm188_vm5, %v2978_v35  ;;  %v1165_v35 = vld [vmem:[#allocation11 + $0x68] sm:$0xff] }
 0x113   :  { %2046 = vmatpush1.bf16.msra.mxu1 %v2797_v22  ;;  %2008 = vmatprep.subr.bf16.mxu0 %v2981_v50  ;;  %v2015_v22 = vpack.c.bf16 %v468_v51, %v466_v9  ;;  %v1171_v9 = vld [vmem:[#allocation11 + $0x98] sm:$0xff] }
 0x114   :  { %2048 = vmatprep.subr.bf16.mxu1 %v2799_v26  ;;  %745 = vmatprep.mubr.f32.mxu1 %v2586_v0  ;;  %v2017_v26 = vpack.c.bf16 %v467_v19, %v465_v62  ;;  %v1233_v62 = vld [vmem:[#allocation11 + $0x288] sm:$0xff] }
 0x116   :  { %2010 = vmatpush1.bf16.msra.mxu0 %v2989_v52  ;;  %1831 = vmatmul.mubr.msk.f32.gmra.mrb[6].mxu1 %vm188_vm5, %v644_v8 }
 0x117   :  { %2050 = vmatpush1.bf16.msra.mxu1 %v2815_v42  ;;  %2012 = vmatprep.subr.bf16.mxu0 %v2011_v5  ;;  %v904_v42 = vrot.slane %v2790_v17, 4  ;;  %v774_v17 = vpop.permute.xlu1 %773 }
 0x118   :  { %2052 = vmatprep.subr.bf16.mxu1 %v2820_v45  ;;  %875 = vmatprep.mubr.f32.mxu1 %v2586_v0 }
 0x119   :  { %v906_v45 = vsel %vm425_vm6, %v904_v42, %v905_v23  ;;  %v1232_v42 = vld [vmem:[#allocation11 + $0x280] sm:$0xff] }
 0x11a   :  { %2014 = vmatpush1.bf16.msra.mxu0 %v2013_v13 }
 0x11b   :  { %2054 = vmatpush1.bf16.msra.mxu1 %v2832_v57  ;;  %2016 = vmatprep.subr.bf16.mxu0 %v2015_v22  ;;  %v778_v57 = vsel %vm188_vm5, %v644_v8, %v774_v17  ;;  %v1169_v8 = vld [vmem:[#allocation11 + $0x88] sm:$0xff] }
 0x11c   :  { %2056 = vmatprep.subr.bf16.mxu1 %v2836_v59  ;;  %v1153_v59 = vld [vmem:[#allocation11 + $0x8] sm:$0xff]  ;;  %v2131_v51 = vpack.c.bf16 %v1171_v9, %v1169_v8  ;;  %v1188_v8 = vld [vmem:[#allocation11 + $0x120] sm:$0xff]  ;;  %v1190_v9 = vld [vmem:[#allocation11 + $0x130] sm:$0xff] }
 0x11d   :  { %v1173_v17 = vld [vmem:[#allocation11 + $0xa8] sm:$0xff] }
 0x11e   :  { %2018 = vmatpush1.bf16.msra.mxu0 %v2017_v26 }
 0x11f   :  { %2058 = vmatpush1.bf16.msra.mxu1 %v2848_v11  ;;  %2076 = vmatprep.subr.bf16.mxu0 %v2886_v55  ;;  %v1155_v11 = vld [vmem:[#allocation11 + $0x18] sm:$0xff] }
 0x120   :  { %2060 = vmatprep.subr.bf16.mxu1 %v2852_v12  ;;  %v2115_v12 = vpack.c.bf16 %v1155_v11, %v1153_v59  ;;  %v1219_v55 = vld [vmem:[#allocation11 + $0x218] sm:$0xff]  ;;  %v1172_v59 = vld [vmem:[#allocation11 + $0xa0] sm:$0xff]  ;;  %v1174_v11 = vld [vmem:[#allocation11 + $0xb0] sm:$0xff] }
 0x121   :  { %538 = vmatmul.mubr.f32.vlgmr.msra.gmra.mrb[4].mxu0 %v2913_v33  ;;  %v1159_v33 = vld [vmem:[#allocation11 + $0x38] sm:$0xff] }
 0x122   :  { %2078 = vmatpush1.bf16.msra.mxu0 %v2902_v10  ;;  %1829 = vmatprep.mubr.msk.f32.mxu0 %vm158_vm3, %v427_v38  ;;  %v1156_v38 = vld [vmem:[#allocation11 + $0x20] sm:$0xff] }
 0x123   :  { %2062 = vmatpush1.bf16.msra.mxu1 %v2863_v31  ;;  %2080 = vmatprep.subr.bf16.mxu0 %v2907_v24  ;;  %v1152_v31 = vld [vmem:[#allocation11] sm:$0xff]  ;;  %v1157_v24 = vld [vmem:[#allocation11 + $0x28] sm:$0xff] }
 0x124   :  { %2064 = vmatprep.subr.bf16.mxu1 %v2867_v32  ;;  %v1154_v32 = vld [vmem:[#allocation11 + $0x10] sm:$0xff] }
 0x125   :  { %544 = vmatmul.mubr.f32.gmra.mrb[6].mxu0 %v2931_v30  ;;  %v1221_v30 = vld [vmem:[#allocation11 + $0x228] sm:$0xff] }
 0x126   :  { %2082 = vmatpush1.bf16.msra.mxu0 %v2917_v34  ;;  %1832 = vmatprep.mubr.msk.f32.mxu0 %vm158_vm3, %v906_v45  ;;  %v2119_v34 = vpack.c.bf16 %v1159_v33, %v1157_v24  ;;  %v1176_v24 = vld [vmem:[#allocation11 + $0xc0] sm:$0xff]  ;;  %v1178_v33 = vld [vmem:[#allocation11 + $0xd0] sm:$0xff] }
 0x127   :  { %2066 = vmatpush1.bf16.msra.mxu1 %v2877_v47  ;;  %2084 = vmatprep.subr.bf16.mxu0 %v2923_v43  ;;  %v1217_v47 = vld [vmem:[#allocation11 + $0x208] sm:$0xff]  ;;  %v1158_v43 = vld [vmem:[#allocation11 + $0x30] sm:$0xff] }
 0x128   :  { %2068 = vmatprep.subr.bf16.mxu1 %v2881_v48  ;;  %v2117_v48 = vpack.c.bf16 %v1154_v32, %v1152_v31  ;;  %v2137_v31 = vpack.c.bf16 %v1174_v11, %v1172_v59  ;;  %v1239_v32 = vld [vmem:[#allocation11 + $0x2b8] sm:$0xff] }
 0x129   :  { %v1259_v11 = vld [vmem:[#allocation11 + $0x358] sm:$0xff] }
 0x12a   :  { %2086 = vmatpush1.bf16.msra.mxu0 %v2935_v54  ;;  %v2121_v54 = vpack.c.bf16 %v1158_v43, %v1156_v38  ;;  %v2141_v38 = vpack.c.bf16 %v1178_v33, %v1176_v24  ;;  %v1243_v43 = vld [vmem:[#allocation11 + $0x2d8] sm:$0xff] }
 0x12b   :  { %2070 = vmatpush1.bf16.msra.mxu1 %v2889_v56  ;;  %2088 = vmatprep.subr.bf16.mxu0 %v2942_v61  ;;  %v1216_v56 = vld [vmem:[#allocation11 + $0x200] sm:$0xff]  ;;  %v1223_v61 = vld [vmem:[#allocation11 + $0x238] sm:$0xff] }
 0x12c   :  { %2072 = vmatprep.subr.bf16.mxu1 %v2893_v58  ;;  %v1218_v58 = vld [vmem:[#allocation11 + $0x210] sm:$0xff]  ;;  %v1263_v33 = vld [vmem:[#allocation11 + $0x378] sm:$0xff] }
 0x12d   :  { %v2181_v10 = vpack.c.bf16 %v1218_v58, %v1216_v56  ;;  %v1177_v58 = vld [vmem:[#allocation11 + $0xc8] sm:$0xff] }
 0x12e   :  { %2090 = vmatpush1.bf16.msra.mxu0 %v2948_v7  ;;  %v1220_v7 = vld [vmem:[#allocation11 + $0x220] sm:$0xff] }
 0x12f   :  { %2074 = vmatpush1.bf16.msra.mxu1 %v2897_v63  ;;  %2092 = vmatprep.subr.bf16.mxu0 %v2952_v46  ;;  %v2179_v63 = vpack.c.bf16 %v1219_v55, %v1217_v47  ;;  %v1222_v46 = vld [vmem:[#allocation11 + $0x230] sm:$0xff]  ;;  %v1236_v47 = vld [vmem:[#allocation11 + $0x2a0] sm:$0xff] }
 0x131   :  { %2180 = vmatprep.subr.bf16.mxu1 %v2179_v63  ;;  %v1179_v63 = vld [vmem:[#allocation11 + $0xd8] sm:$0xff] }
 0x132   :  { %876 = vmatmul.mubr.f32.vlgmr.msra.gmra.mrb[8].mxu1 %v777_v18  ;;  %2094 = vmatpush1.bf16.msra.mxu0 %v2956_v14  ;;  %v2183_v14 = vpack.c.bf16 %v1223_v61, %v1221_v30  ;;  %v1240_v30 = vld [vmem:[#allocation11 + $0x2c0] sm:$0xff] }
 0x133   :  { %881 = vmatprep.mubr.f32.mxu1 %v2586_v0  ;;  %2096 = vmatprep.subr.bf16.mxu0 %v2960_v16  ;;  %v2185_v16 = vpack.c.bf16 %v1222_v46, %v1220_v7  ;;  %v1181_v46 = vld [vmem:[#allocation11 + $0xe8] sm:$0xff] }
 0x134   :  { %2182 = vmatpush1.bf16.msra.mxu1 %v2181_v10  ;;  %v2139_v10 = vpack.c.bf16 %v1179_v63, %v1177_v58  ;;  %v1196_v58 = vld [vmem:[#allocation11 + $0x160] sm:$0xff]  ;;  %v1198_v63 = vld [vmem:[#allocation11 + $0x170] sm:$0xff] }
 0x135   :  { %2184 = vmatprep.subr.bf16.mxu1 %v2183_v14  ;;  %v1183_v14 = vld [vmem:[#allocation11 + $0xf8] sm:$0xff]  ;;  %v2161_v24 = vpack.c.bf16 %v1198_v63, %v1196_v58 }
 0x136   :  { %882 = vmatmul.mubr.f32.gmra.mrb[10].mxu1 %v778_v57  ;;  %2098 = vmatpush1.bf16.msra.mxu0 %v2964_v4  ;;  %v2123_v4 = vpack.c.bf16 %v1163_v25, %v1161_v29  ;;  %v1180_v29 = vld [vmem:[#allocation11 + $0xe0] sm:$0xff]  ;;  %v1182_v25 = vld [vmem:[#allocation11 + $0xf0] sm:$0xff] }
 0x137   :  { %2100 = vmatprep.subr.bf16.mxu0 %v2968_v15  ;;  %v1160_v15 = vld [vmem:[#allocation11 + $0x40] sm:$0xff] }
 0x138   :  { %2186 = vmatpush1.bf16.msra.mxu1 %v2185_v16  ;;  %v2125_v20 = vpack.c.bf16 %v1162_v27, %v1160_v15  ;;  %v2143_v16 = vpack.c.bf16 %v1183_v14, %v1181_v46  ;;  %v2145_v15 = vpack.c.bf16 %v1182_v25, %v1180_v29  ;;  %v1247_v27 = vld [vmem:[#allocation11 + $0x2f8] sm:$0xff]  ;;  %v1200_v46 = vld [vmem:[#allocation11 + $0x180] sm:$0xff]  ;;  %v1202_v14 = vld [vmem:[#allocation11 + $0x190] sm:$0xff] }
 0x139   :  { %2188 = vmatprep.subr.bf16.mxu1 %v2187_v44  ;;  %v1187_v44 = vld [vmem:[#allocation11 + $0x118] sm:$0xff]  ;;  %v2165_v29 = vpack.c.bf16 %v1202_v14, %v1200_v46 }
 0x13a   :  { %2102 = vmatpush1.bf16.msra.mxu0 %v2974_v49  ;;  %v2189_v49 = vpack.c.bf16 %v1226_v41, %v1224_v40  ;;  %v1185_v41 = vld [vmem:[#allocation11 + $0x108] sm:$0xff]  ;;  %v1267_v25 = vld [vmem:[#allocation11 + $0x398] sm:$0xff] }
 0x13b   :  { %2104 = vmatprep.subr.bf16.mxu0 %v2981_v50  ;;  %v1167_v50 = vld [vmem:[#allocation11 + $0x78] sm:$0xff] }
 0x13c   :  { %v2127_v39 = vpack.c.bf16 %v1167_v50, %v1165_v35  ;;  %2190 = vmatpush1.bf16.msra.mxu1 %v2189_v49  ;;  %v2147_v49 = vpack.c.bf16 %v1187_v44, %v1185_v41  ;;  %v1184_v35 = vld [vmem:[#allocation11 + $0x100] sm:$0xff]  ;;  %v1186_v50 = vld [vmem:[#allocation11 + $0x110] sm:$0xff] }
 0x13d   :  { %2192 = vmatprep.subr.bf16.mxu1 %v2191_v6  ;;  %v2149_v1 = vpack.c.bf16 %v1186_v50, %v1184_v35  ;;  %v1191_v6 = vld [vmem:[#allocation11 + $0x138] sm:$0xff]  ;;  %v1206_v44 = vld [vmem:[#allocation11 + $0x1b0] sm:$0xff] }
 0x13e   :  { %2106 = vmatpush1.bf16.msra.mxu0 %v2989_v52  ;;  %v1228_v52 = vld [vmem:[#allocation11 + $0x260] sm:$0xff]  ;;  %v1271_v35 = vld [vmem:[#allocation11 + $0x3b8] sm:$0xff] }
 0x13f   :  { %2108 = vmatprep.subr.bf16.mxu0 %v2011_v5  ;;  %v1230_v5 = vld [vmem:[#allocation11 + $0x270] sm:$0xff] }
 0x140   :  { %v2193_v21 = vpack.c.bf16 %v1230_v5, %v1228_v52  ;;  %v1189_v5 = vld [vmem:[#allocation11 + $0x128] sm:$0xff] }
 0x142   :  { %2110 = vmatpush1.bf16.msra.mxu0 %v2013_v13  ;;  %v1168_v13 = vld [vmem:[#allocation11 + $0x80] sm:$0xff]  ;;  %2194 = vmatpush1.bf16.msra.mxu1 %v2193_v21  ;;  %v2151_v21 = vpack.c.bf16 %v1191_v6, %v1189_v5  ;;  %v1210_v5 = vld [vmem:[#allocation11 + $0x1d0] sm:$0xff] }
 0x143   :  { %2112 = vmatprep.subr.bf16.mxu0 %v2015_v22  ;;  %v1170_v22 = vld [vmem:[#allocation11 + $0x90] sm:$0xff] }
 0x144   :  { %v2133_v19 = vpack.c.bf16 %v1170_v22, %v1168_v13  ;;  %v2153_v13 = vpack.c.bf16 %v1190_v9, %v1188_v8  ;;  %v1255_v22 = vld [vmem:[#allocation11 + $0x338] sm:$0xff]  ;;  %v1272_v9 = vld [vmem:[#allocation11 + $0x3c0] sm:$0xff] }
 0x145   :  { %v1275_v8 = vld [vmem:[#allocation11 + $0x3d8] sm:$0xff] }
 0x146   :  { %2114 = vmatpush1.bf16.msra.mxu0 %v2017_v26  ;;  %v1235_v26 = vld [vmem:[#allocation11 + $0x298] sm:$0xff] }
 0x147   :  { %2116 = vmatprep.subr.bf16.mxu0 %v2115_v12  ;;  %v2195_v45 = vpack.c.bf16 %v1235_v26, %v1233_v62  ;;  %v1237_v12 = vld [vmem:[#allocation11 + $0x2a8] sm:$0xff]  ;;  %v1252_v62 = vld [vmem:[#allocation11 + $0x320] sm:$0xff] }
 0x148   :  { %v2199_v55 = vpack.c.bf16 %v1239_v32, %v1237_v12  ;;  %v1256_v12 = vld [vmem:[#allocation11 + $0x340] sm:$0xff] }
 0x149   :  { %1016 = vmatmul.mubr.f32.vlgmr.msra.gmra.mrb[8].mxu0 %v777_v18  ;;  %v1175_v18 = vld [vmem:[#allocation11 + $0xb8] sm:$0xff]  ;;  %2196 = vmatprep.subr.bf16.mxu1 %v2195_v45 }
 0x14a   :  { %1833 = vmatprep.mubr.msk.f32.mxu0 %vm158_vm3, %v905_v23  ;;  %2118 = vmatpush1.bf16.msra.mxu0 %v2117_v48  ;;  %v1234_v23 = vld [vmem:[#allocation11 + $0x290] sm:$0xff]  ;;  %v1195_v45 = vld [vmem:[#allocation11 + $0x158] sm:$0xff] }
 0x14b   :  { %2120 = vmatprep.subr.bf16.mxu0 %v2119_v34  ;;  %v2197_v2 = vpack.c.bf16 %v1234_v23, %v1232_v42  ;;  %v1238_v48 = vld [vmem:[#allocation11 + $0x2b0] sm:$0xff]  ;;  %v1241_v34 = vld [vmem:[#allocation11 + $0x2c8] sm:$0xff] }
 0x14c   :  { %v2201_v56 = vpack.c.bf16 %v1238_v48, %v1236_v47  ;;  %v2203_v61 = vpack.c.bf16 %v1243_v43, %v1241_v34  ;;  %v1193_v23 = vld [vmem:[#allocation11 + $0x148] sm:$0xff]  ;;  %v1260_v34 = vld [vmem:[#allocation11 + $0x360] sm:$0xff] }
 0x14d   :  { %1022 = vmatmul.mubr.f32.gmra.mrb[10].mxu0 %v778_v57  ;;  %v2135_v57 = vpack.c.bf16 %v1175_v18, %v1173_v17  ;;  %2198 = vmatpush1.bf16.msra.mxu1 %v2197_v2  ;;  %v2155_v2 = vpack.c.bf16 %v1195_v45, %v1193_v23  ;;  %v1192_v17 = vld [vmem:[#allocation11 + $0x140] sm:$0xff]  ;;  %v1194_v18 = vld [vmem:[#allocation11 + $0x150] sm:$0xff]  ;;  %v1197_v48 = vld [vmem:[#allocation11 + $0x168] sm:$0xff] }
 0x14e   :  { %2122 = vmatpush1.bf16.msra.mxu0 %v2121_v54  ;;  %2200 = vmatprep.subr.bf16.mxu1 %v2199_v55  ;;  %v1242_v54 = vld [vmem:[#allocation11 + $0x2d0] sm:$0xff]  ;;  %v2157_v59 = vpack.c.bf16 %v1194_v18, %v1192_v17  ;;  %v1199_v55 = vld [vmem:[#allocation11 + $0x178] sm:$0xff]  ;;  %v1277_v45 = vld [vmem:[#allocation11 + $0x3e8] sm:$0xff] }
 0x14f   :  { %2124 = vmatprep.subr.bf16.mxu0 %v2123_v4  ;;  %v2205_v7 = vpack.c.bf16 %v1242_v54, %v1240_v30  ;;  %v1245_v4 = vld [vmem:[#allocation11 + $0x2e8] sm:$0xff]  ;;  %v1214_v23 = vld [vmem:[#allocation11 + $0x1f0] sm:$0xff]  ;;  %v1279_v17 = vld [vmem:[#allocation11 + $0x3f8] sm:$0xff] }
 0x150   :  { %v2207_v37 = vpack.c.bf16 %v1247_v27, %v1245_v4  ;;  %v1201_v54 = vld [vmem:[#allocation11 + $0x188] sm:$0xff]  ;;  %v1264_v4 = vld [vmem:[#allocation11 + $0x380] sm:$0xff]  ;;  %v2239_v18 = vpack.c.bf16 %v1279_v17, %v1277_v45 }
 0x151   :  { %2202 = vmatpush1.bf16.msra.mxu1 %v2201_v56  ;;  %v2159_v56 = vpack.c.bf16 %v1199_v55, %v1197_v48 }
 0x152   :  { %2126 = vmatpush1.bf16.msra.mxu0 %v2125_v20  ;;  %2204 = vmatprep.subr.bf16.mxu1 %v2203_v61  ;;  %v1246_v20 = vld [vmem:[#allocation11 + $0x2f0] sm:$0xff]  ;;  %v1203_v61 = vld [vmem:[#allocation11 + $0x198] sm:$0xff] }
 0x153   :  { %2128 = vmatprep.subr.bf16.mxu0 %v2127_v39  ;;  %v2209_v40 = vpack.c.bf16 %v1246_v20, %v1244_v28  ;;  %v1249_v39 = vld [vmem:[#allocation11 + $0x308] sm:$0xff] }
 0x154   :  { %v2211_v3 = vpack.c.bf16 %v1251_v53, %v1249_v39  ;;  %v1205_v20 = vld [vmem:[#allocation11 + $0x1a8] sm:$0xff]  ;;  %v1270_v53 = vld [vmem:[#allocation11 + $0x3b0] sm:$0xff] }
 0x155   :  { %2206 = vmatpush1.bf16.msra.mxu1 %v2205_v7  ;;  %v2163_v7 = vpack.c.bf16 %v1203_v61, %v1201_v54 }
 0x156   :  { %2130 = vmatpush1.bf16.msra.mxu0 %v2129_v36  ;;  %2208 = vmatprep.subr.bf16.mxu1 %v2207_v37  ;;  %v1250_v36 = vld [vmem:[#allocation11 + $0x310] sm:$0xff]  ;;  %v1207_v37 = vld [vmem:[#allocation11 + $0x1b8] sm:$0xff] }
 0x157   :  { %2132 = vmatprep.subr.bf16.mxu0 %v2131_v51  ;;  %v2213_v52 = vpack.c.bf16 %v1250_v36, %v1248_v60  ;;  %v1253_v51 = vld [vmem:[#allocation11 + $0x328] sm:$0xff]  ;;  %v2167_v41 = vpack.c.bf16 %v1207_v37, %v1205_v20  ;;  %v578_v20 = vlaneseq }
 0x158   :  { %v2215_v26 = vpack.c.bf16 %v1255_v22, %v1253_v51  ;;  %v1209_v60 = vld [vmem:[#allocation11 + $0x1c8] sm:$0xff]  ;;  %v1274_v22 = vld [vmem:[#allocation11 + $0x3d0] sm:$0xff] }
 0x159   :  { %2210 = vmatpush1.bf16.msra.mxu1 %v2209_v40  ;;  %v1204_v40 = vld [vmem:[#allocation11 + $0x1a0] sm:$0xff]  ;;  %vm3064_vm7 = vcmp.lt.s32.totalorder %v578_v20, 768 }
 0x15a   :  { %2134 = vmatpush1.bf16.msra.mxu0 %v2133_v19  ;;  %2212 = vmatprep.subr.bf16.mxu1 %v2211_v3  ;;  %v1254_v19 = vld [vmem:[#allocation11 + $0x330] sm:$0xff]  ;;  %v2169_v50 = vpack.c.bf16 %v1206_v44, %v1204_v40  ;;  %v1211_v3 = vld [vmem:[#allocation11 + $0x1d8] sm:$0xff] }
 0x15b   :  { %2136 = vmatprep.subr.bf16.mxu0 %v2135_v57  ;;  %v2217_v42 = vpack.c.bf16 %v1254_v19, %v1252_v62  ;;  %v1257_v57 = vld [vmem:[#allocation11 + $0x348] sm:$0xff]  ;;  %v2171_v6 = vpack.c.bf16 %v1211_v3, %v1209_v60  ;;  %v1215_v19 = vld [vmem:[#allocation11 + $0x1f8] sm:$0xff] }
 0x15c   :  { %v2219_v32 = vpack.c.bf16 %v1259_v11, %v1257_v57  ;;  %v1213_v62 = vld [vmem:[#allocation11 + $0x1e8] sm:$0xff]  ;;  %v1276_v57 = vld [vmem:[#allocation11 + $0x3e0] sm:$0xff] }
 0x15d   :  { %2214 = vmatpush1.bf16.msra.mxu1 %v2213_v52  ;;  %v1208_v52 = vld [vmem:[#allocation11 + $0x1c0] sm:$0xff] }
 0x15e   :  { %2138 = vmatpush1.bf16.msra.mxu0 %v2137_v31  ;;  %2216 = vmatprep.subr.bf16.mxu1 %v2215_v26  ;;  %v1258_v31 = vld [vmem:[#allocation11 + $0x350] sm:$0xff]  ;;  %v2173_v51 = vpack.c.bf16 %v1210_v5, %v1208_v52  ;;  %v2175_v26 = vpack.c.bf16 %v1215_v19, %v1213_v62 }
 0x15f   :  { %2140 = vmatprep.subr.bf16.mxu0 %v2139_v10  ;;  %v2221_v47 = vpack.c.bf16 %v1258_v31, %v1256_v12  ;;  %v1261_v10 = vld [vmem:[#allocation11 + $0x368] sm:$0xff] }
 0x160   :  { %v2223_v43 = vpack.c.bf16 %v1263_v33, %v1261_v10  ;;  %v1281_v31 = vld [vmem:[#allocation11 + $0x408] sm:$0xff] }
 0x161   :  { %2218 = vmatpush1.bf16.msra.mxu1 %v2217_v42  ;;  %v1212_v42 = vld [vmem:[#allocation11 + $0x1e0] sm:$0xff] }
 0x162   :  { %2142 = vmatpush1.bf16.msra.mxu0 %v2141_v38  ;;  %2220 = vmatprep.subr.bf16.mxu1 %v2219_v32  ;;  %v1262_v38 = vld [vmem:[#allocation11 + $0x370] sm:$0xff]  ;;  %v2177_v11 = vpack.c.bf16 %v1214_v23, %v1212_v42  ;;  %v1283_v32 = vld [vmem:[#allocation11 + $0x418] sm:$0xff] }
 0x163   :  { %2144 = vmatprep.subr.bf16.mxu0 %v2143_v16  ;;  %v2225_v30 = vpack.c.bf16 %v1262_v38, %v1260_v34  ;;  %v1265_v16 = vld [vmem:[#allocation11 + $0x388] sm:$0xff] }
 0x164   :  { %v2227_v27 = vpack.c.bf16 %v1267_v25, %v1265_v16 }
 0x165   :  { %2222 = vmatpush1.bf16.msra.mxu1 %v2221_v47  ;;  %v2243_v47 = vpack.c.bf16 %v1283_v32, %v1281_v31 }
 0x166   :  { %2146 = vmatpush1.bf16.msra.mxu0 %v2145_v15  ;;  %2224 = vmatprep.subr.bf16.mxu1 %v2223_v43  ;;  %v1266_v15 = vld [vmem:[#allocation11 + $0x390] sm:$0xff] }
 0x167   :  { %2148 = vmatprep.subr.bf16.mxu0 %v2147_v49  ;;  %v2229_v28 = vpack.c.bf16 %v1266_v15, %v1264_v4  ;;  %v1269_v49 = vld [vmem:[#allocation11 + $0x3a8] sm:$0xff] }
 0x168   :  { %v2231_v39 = vpack.c.bf16 %v1271_v35, %v1269_v49 }
 0x169   :  { %2226 = vmatpush1.bf16.msra.mxu1 %v2225_v30 }
 0x16a   :  { %2150 = vmatpush1.bf16.msra.mxu0 %v2149_v1  ;;  %2228 = vmatprep.subr.bf16.mxu1 %v2227_v27  ;;  %v1268_v1 = vld [vmem:[#allocation11 + $0x3a0] sm:$0xff]  ;;  %v2590_v27 = vmov 1966171168  }
 0x16b   :  { %2152 = vmatprep.subr.bf16.mxu0 %v2151_v21  ;;  %v2233_v36 = vpack.c.bf16 %v1270_v53, %v1268_v1  ;;  %v1273_v21 = vld [vmem:[#allocation11 + $0x3c8] sm:$0xff]  ;;  %v3047_v53 = vshrl.u32 %v578_v20, 7 }
 0x16d   :  { %2230 = vmatpush1.bf16.msra.mxu1 %v2229_v28  ;;  %v576_v28 = vunpack.c.l.s4 %v2590_v27 }
 0x16e   :  { %2154 = vmatpush1.bf16.msra.mxu0 %v2153_v13  ;;  %2232 = vmatprep.subr.bf16.mxu1 %v2231_v39  ;;  %v2235_v13 = vpack.c.bf16 %v1275_v8, %v1273_v21 }
 0x16f   :  { %2156 = vmatprep.subr.bf16.mxu0 %v2155_v2  ;;  %v2237_v2 = vpack.c.bf16 %v1274_v22, %v1272_v9  ;;  %v577_v1 = vunpack.c.0.s8 %v576_v28 }
 0x171   :  { %2234 = vmatpush1.bf16.msra.mxu1 %v2233_v36  ;;  %v3050_v9 = vsub.s32 %v577_v1, %v3047_v53 }
 0x172   :  { %2158 = vmatpush1.bf16.msra.mxu0 %v2157_v59  ;;  %2236 = vmatprep.subr.bf16.mxu1 %v2235_v13  ;;  %v1278_v59 = vld [vmem:[#allocation11 + $0x3f0] sm:$0xff] }
 0x173   :  { %2160 = vmatprep.subr.bf16.mxu0 %v2159_v56  ;;  %v2241_v12 = vpack.c.bf16 %v1278_v59, %v1276_v57 }
 0x175   :  { %2238 = vmatpush1.bf16.msra.mxu1 %v2237_v2 }
 0x176   :  { %2162 = vmatpush1.bf16.msra.mxu0 %v2161_v24  ;;  %2240 = vmatprep.subr.bf16.mxu1 %v2239_v18 }
 0x177   :  { %2164 = vmatprep.subr.bf16.mxu0 %v2163_v7 }
 0x179   :  { %2242 = vmatpush1.bf16.msra.mxu1 %v2241_v12 }
 0x17a   :  { %2166 = vmatpush1.bf16.msra.mxu0 %v2165_v29  ;;  %2244 = vmatprep.subr.bf16.mxu1 %v2243_v47 }
 0x17b   :  { %2168 = vmatprep.subr.bf16.mxu0 %v2167_v41 }
 0x17e   :  { %2170 = vmatpush1.bf16.msra.mxu0 %v2169_v50 }
 0x17f   :  { %2172 = vmatprep.subr.bf16.mxu0 %v2171_v6 }
 0x182   :  { %2174 = vmatpush1.bf16.msra.mxu0 %v2173_v51 }
 0x183   :  { %2176 = vmatprep.subr.bf16.mxu0 %v2175_v26 }
 0x186   :  { %2178 = vmatpush1.bf16.msra.mxu0 %v2177_v11 }
 0x1cc   :  { %v261_v48 = vpop.f32.mrb[0].mxu0 }
 0x1cd   :  { %v263_v55 = vpop.f32.mrb[1].mxu0  ;;  %v398_v56 = vpop.f32.mrb[0].mxu1 }
 0x1ce   :  { %v400_v58 = vpop.f32.mrb[1].mxu1 }
 0x1d0   :  { %v267_v63 = vpop.f32.mrb[2].mxu0 }
 0x1d1   :  { %v272_v10 = vsel %vm148_vm2, %v267_v63, -inf  ;;  %v269_v24 = vpop.f32.mrb[3].mxu0  ;;  %v404_v33 = vpop.f32.mrb[2].mxu1 }
 0x1d2   :  { %v273_v34 = vmax.f32 %v261_v48, %v272_v10  ;;  %v280_v38 = vsel %vm148_vm2, %v269_v24, -inf  ;;  %v409_v43 = vsel %vm288_vm1, %v404_v33, -inf  ;;  %v406_v30 = vpop.f32.mrb[3].mxu1 }
 0x1d3   :  { %v281_v54 = vmax.f32 %v263_v55, %v280_v38  ;;  %v410_v61 = vmax.f32 %v398_v56, %v409_v43  ;;  %v417_v7 = vsel %vm288_vm1, %v406_v30, -inf }
 0x1d4   :  { %v274_v46 = vrot.slane %v273_v34, 4  ;;  %v418_v14 = vmax.f32 %v400_v58, %v417_v7 }
 0x1d5   :  { %v282_v16 = vrot.slane %v281_v54, 4  ;;  %v411_v29 = vrot.slane %v410_v61, 4 }
 0x1d6   :  { %v275_v25 = vmax.f32 %v273_v34, %v274_v46  ;;  %v419_v4 = vrot.slane %v418_v14, 4 }
 0x1d7   :  { %v283_v15 = vmax.f32 %v281_v54, %v282_v16  ;;  %v412_v37 = vmax.f32 %v410_v61, %v411_v29 }
 0x1d8   :  { %v276_v40 = vrot.slane %v275_v25, 2  ;;  %v420_v41 = vmax.f32 %v418_v14, %v419_v4 }
 0x1d9   :  { %v284_v44 = vrot.slane %v283_v15, 2  ;;  %v413_v49 = vrot.slane %v412_v37, 2 }
 0x1da   :  { %v277_v35 = vmax.f32 %v275_v25, %v276_v40  ;;  %v421_v50 = vrot.slane %v420_v41, 2 }
 0x1db   :  { %v285_v39 = vmax.f32 %v283_v15, %v284_v44  ;;  %v414_v60 = vmax.f32 %v412_v37, %v413_v49 }
 0x1dc   :  { %v278_v36 = vrot.slane %v277_v35, 1  ;;  %v422_v3 = vmax.f32 %v420_v41, %v421_v50 }
 0x1dd   :  { %v286_v52 = vrot.slane %v285_v39, 1  ;;  %v415_v5 = vrot.slane %v414_v60, 1 }
 0x1de   :  { %v279_v6 = vmax.f32 %v277_v35, %v278_v36  ;;  %v423_v21 = vrot.slane %v422_v3, 1 }
 0x1df   :  { %v287_v8 = vmax.f32 %v285_v39, %v286_v52  ;;  %v416_v51 = vmax.f32 %v414_v60, %v415_v5 }
 0x1e0   :  { %v424_v13 = vmax.f32 %v422_v3, %v423_v21 }
 0x1e1   :  { %v572_v22 = vcombine.low %v279_v6, %v287_v8 }
 0x1e2   :  { %v573_v62 = vcombine.low %v416_v51, %v424_v13  ;;  %v1285_v13 = vld [vmem:[#allocation11 + $0x428] sm:$0xff] }
 0x1e3   :  { %v581_v19 = vrot.slane %v572_v22, %v3050_v9 }
 0x1e4   :  { %v588_v26 = vrot.slane %v573_v62, %v3050_v9 }
 0x1e5   :  { %v741_v42 = vpop.f32.mrb[4].mxu1 }
 0x1e6   :  { %v596_v23 = vcombine.low %v581_v19, %v588_v26  ;;  %v743_v45 = vpop.f32.mrb[5].mxu1 }
 0x1e8   :  { %v603_v21 = vrot.slane %v596_v23, %v3050_v9 }
 0x1e9   :  { %v747_v2 = vpop.f32.mrb[6].mxu1 }
 0x1ea   :  { %v752_v17 = vsel %vm148_vm2, %v747_v2, -inf  ;;  %v749_v18 = vpop.f32.mrb[7].mxu1 }
 0x1eb   :  { %v753_v57 = vmax.f32 %v741_v42, %v752_v17  ;;  %v760_v59 = vsel %vm148_vm2, %v749_v18, -inf }
 0x1ec   :  { %v761_v11 = vmax.f32 %v743_v45, %v760_v59 }
 0x1ed   :  { %v754_v12 = vrot.slane %v753_v57, 4 }
 0x1ee   :  { %v762_v31 = vrot.slane %v761_v11, 4 }
 0x1ef   :  { %v755_v32 = vmax.f32 %v753_v57, %v754_v12 }
 0x1f0   :  { %v763_v47 = vmax.f32 %v761_v11, %v762_v31 }
 0x1f1   :  { %v756_v48 = vrot.slane %v755_v32, 2 }
 0x1f2   :  { %v764_v55 = vrot.slane %v763_v47, 2 }
 0x1f3   :  { %v757_v56 = vmax.f32 %v755_v32, %v756_v48 }
 0x1f4   :  { %v539_v58 = vpop.f32.mrb[4].mxu0  ;;  %v765_v63 = vmax.f32 %v763_v47, %v764_v55 }
 0x1f5   :  { %v758_v10 = vrot.slane %v757_v56, 1  ;;  %v541_v24 = vpop.f32.mrb[5].mxu0 }
 0x1f6   :  { %v766_v33 = vrot.slane %v765_v63, 1 }
 0x1f7   :  { %v759_v34 = vmax.f32 %v757_v56, %v758_v10 }
 0x1f8   :  { %v767_v38 = vmax.f32 %v765_v63, %v766_v33  ;;  %v545_v43 = vpop.f32.mrb[6].mxu0 }
 0x1f9   :  { %v550_v30 = vsel %vm425_vm6, %v545_v43, -inf  ;;  %v547_v54 = vpop.f32.mrb[7].mxu0 }
 0x1fa   :  { %v1050_v61 = vcombine.low %v759_v34, %v767_v38  ;;  %v551_v7 = vmax.f32 %v539_v58, %v550_v30  ;;  %v558_v46 = vsel %vm425_vm6, %v547_v54, -inf }
 0x1fb   :  { %v559_v14 = vmax.f32 %v541_v24, %v558_v46  ;;  %v1099_v46 = vsub.s32 0, %v3047_v53 }
 0x1fc   :  { %v552_v16 = vrot.slane %v551_v7, 4  ;;  %v1059_v20 = vrot.slane %v1050_v61, %v3050_v9 }
 0x1fd   :  { %v560_v29 = vrot.slane %v559_v14, 4 }
 0x1fe   :  { %v553_v25 = vmax.f32 %v551_v7, %v552_v16 }
 0x1ff   :  { %v561_v4 = vmax.f32 %v559_v14, %v560_v29  ;;  %v2591_v14 = vmov 1983009808  }
 0x200   :  { %v554_v15 = vrot.slane %v553_v25, 2  ;;  %v1124_v16 = vunpack.c.l.s4 %v2591_v14 }
 0x201   :  { %v562_v27 = vrot.slane %v561_v4, 2 }
 0x202   :  { %v555_v28 = vmax.f32 %v553_v25, %v554_v15  ;;  %v1095_v25 = vld [vmem:[%s3128_s4] sm:$0x3f]  ;;  %v1107_v15 = vsub.s32 2, %v3047_v53 }
 0x203   :  { %v563_v37 = vmax.f32 %v561_v4, %v562_v27  ;;  %v1103_v4 = vsub.s32 1, %v3047_v53  ;;  %v1111_v27 = vsub.s32 3, %v3047_v53 }
 0x204   :  { %v556_v40 = vrot.slane %v555_v28, 1 }
 0x205   :  { %v564_v41 = vrot.slane %v563_v37, 1  ;;  %v877_v44 = vpop.f32.mrb[8].mxu1 }
 0x206   :  { %v557_v49 = vmax.f32 %v555_v28, %v556_v40  ;;  %v879_v35 = vpop.f32.mrb[9].mxu1  ;;  %v1100_v40 = vrot.slane %v1095_v25, %v1099_v46 }
 0x207   :  { %v565_v50 = vmax.f32 %v563_v37, %v564_v41  ;;  %v1125_v41 = vunpack.c.0.s8 %v1124_v16  ;;  %v1292_v16 = vld [vmem:[#allocation11 + $0x460] sm:$0xff] }
 0x209   :  { %v574_v39 = vcombine.low %v557_v49, %v565_v50  ;;  %v883_v1 = vpop.f32.mrb[10].mxu1  ;;  %v1119_v49 = vsub.s32 5, %v3047_v53  ;;  %v1104_v50 = vrot.slane %v1095_v25, %v1103_v4 }
 0x20a   :  { %v888_v60 = vsel %vm288_vm1, %v883_v1, -inf  ;;  %v885_v36 = vpop.f32.mrb[11].mxu1  ;;  %v1112_v1 = vrot.slane %v1095_v25, %v1111_v27 }
 0x20b   :  { %v595_v3 = vrot.slane %v574_v39, %v3050_v9  ;;  %v889_v52 = vmax.f32 %v877_v44, %v888_v60  ;;  %v896_v5 = vsel %vm288_vm1, %v885_v36, -inf  ;;  %v1115_v44 = vsub.s32 4, %v3047_v53 }
 0x20c   :  { %v897_v6 = vmax.f32 %v879_v35, %v896_v5  ;;  %v1108_v39 = vrot.slane %v1095_v25, %v1107_v15  ;;  %v1128_v36 = vsub.s32 %v1125_v41, %v3047_v53  ;;  %v1299_v15 = vld [vmem:[#allocation11 + $0x498] sm:$0xff]  ;;  %v1301_v41 = vld [vmem:[#allocation11 + $0x4a8] sm:$0xff]  ;;  %v1718_v53 = vld [vmem:[#allocation14 + $0x20] sm:$0xff] }
 0x20d   :  { %v610_v8 = vrot.slane %v595_v3, %v3050_v9  ;;  %v890_v51 = vrot.slane %v889_v52, 4  ;;  %v1116_v3 = vrot.slane %v1095_v25, %v1115_v44  ;;  %v1303_v44 = vld [vmem:[#allocation11 + $0x4b8] sm:$0xff] }
 0x20e   :  { %v898_v22 = vrot.slane %v897_v6, 4 }
 0x20f   :  { %v611_v62 = vcombine.low %v603_v21, %v610_v8  ;;  %v891_v19 = vmax.f32 %v889_v52, %v890_v51  ;;  %v1120_v52 = vrot.slane %v1095_v25, %v1119_v49  ;;  %v1121_v21 = vcombine.low %v1100_v40, %v1104_v50  ;;  %v1297_v25 = vld [vmem:[#allocation11 + $0x488] sm:$0xff]  ;;  %v1298_v40 = vld [vmem:[#allocation11 + $0x490] sm:$0xff]  ;;  %v1300_v50 = vld [vmem:[#allocation11 + $0x4a0] sm:$0xff] }
 0x210   :  { %v899_v26 = vmax.f32 %v897_v6, %v898_v22  ;;  %v1122_v8 = vcombine.low %v1108_v39, %v1112_v1  ;;  %v1302_v39 = vld [vmem:[#allocation11 + $0x4b0] sm:$0xff]  ;;  %v1305_v1 = vld [vmem:[#allocation11 + $0x4c8] sm:$0xff] }
 0x211   :  { %617 = vst.msk [vmem:[#allocation2] ss:$2 sm:$0x3f] %vm3064_vm7, %v611_v62  ;;  %v892_v42 = vrot.slane %v891_v19, 2  ;;  %v1129_v22 = vrot.slane %v1121_v21, %v1128_v36  ;;  %v1311_v21 = vld [vmem:[#allocation11 + $0x4f8] sm:$0xff] }
 0x212   :  { %v900_v45 = vrot.slane %v899_v26, 2  ;;  %v1136_v62 = vrot.slane %v1122_v8, %v1128_v36 }
 0x213   :  { %v893_v2 = vmax.f32 %v891_v19, %v892_v42  ;;  %v1138_v19 = vcombine.low %v1116_v3, %v1120_v52  ;;  %v1304_v52 = vld [vmem:[#allocation11 + $0x4c0] sm:$0xff] }
 0x214   :  { %v901_v17 = vmax.f32 %v899_v26, %v900_v45  ;;  %v1137_v26 = vcombine.low %v1129_v22, %v1136_v62  ;;  %v1308_v22 = vld [vmem:[#allocation11 + $0x4e0] sm:$0xff]  ;;  %v1310_v62 = vld [vmem:[#allocation11 + $0x4f0] sm:$0xff] }
 0x215   :  { %v894_v23 = vrot.slane %v893_v2, 1  ;;  %v1145_v42 = vrot.slane %v1138_v19, %v1128_v36  ;;  %v1313_v19 = vld [vmem:[#allocation11 + $0x508] sm:$0xff] }
 0x216   :  { %v902_v18 = vrot.slane %v901_v17, 1 }
 0x217   :  { %v895_v57 = vmax.f32 %v893_v2, %v894_v23 }
 0x218   :  { %v903_v59 = vmax.f32 %v901_v17, %v902_v18 }
 0x21a   :  { %v1051_v11 = vcombine.low %v895_v57, %v903_v59 }
 0x21c   :  { %v1066_v12 = vrot.slane %v1051_v11, %v3050_v9  ;;  %v1017_v31 = vpop.f32.mrb[8].mxu0 }
 0x21d   :  { %v1019_v32 = vpop.f32.mrb[9].mxu0 }
 0x21e   :  { %v1074_v47 = vcombine.low %v1059_v20, %v1066_v12  ;;  %v1282_v20 = vld [vmem:[#allocation11 + $0x410] sm:$0xff] }
 0x220   :  { %v1023_v48 = vpop.f32.mrb[10].mxu0  ;;  %v1081_v5 = vrot.slane %v1074_v47, %v3050_v9  ;;  %v1287_v47 = vld [vmem:[#allocation11 + $0x438] sm:$0xff] }
 0x221   :  { %v1028_v55 = vsel %vm425_vm6, %v1023_v48, -inf  ;;  %v1025_v56 = vpop.f32.mrb[11].mxu0 }
 0x222   :  { %v1029_v58 = vmax.f32 %v1017_v31, %v1028_v55  ;;  %v1036_v63 = vsel %vm425_vm6, %v1025_v56, -inf  ;;  %v2247_v56 = vpack.c.bf16 %v1287_v47, %v1285_v13  ;;  %v1320_v47 = vld [vmem:[#allocation11 + $0x540] sm:$0xff] }
 0x223   :  { %v1037_v10 = vmax.f32 %v1019_v32, %v1036_v63  ;;  %v1286_v63 = vld [vmem:[#allocation11 + $0x430] sm:$0xff] }
 0x224   :  { %v1030_v24 = vrot.slane %v1029_v58, 4 }
 0x225   :  { %v1038_v33 = vrot.slane %v1037_v10, 4 }
 0x226   :  { %v1031_v34 = vmax.f32 %v1029_v58, %v1030_v24  ;;  %v1284_v58 = vld [vmem:[#allocation11 + $0x420] sm:$0xff]  ;;  %v1289_v24 = vld [vmem:[#allocation11 + $0x448] sm:$0xff] }
 0x227   :  { %v1039_v38 = vmax.f32 %v1037_v10, %v1038_v33  ;;  %v1291_v33 = vld [vmem:[#allocation11 + $0x458] sm:$0xff] }
 0x228   :  { %v1032_v43 = vrot.slane %v1031_v34, 2 }
 0x229   :  { %v1040_v30 = vrot.slane %v1039_v38, 2 }
 0x22a   :  { %v1033_v54 = vmax.f32 %v1031_v34, %v1032_v43  ;;  %v2249_v34 = vpack.c.bf16 %v1286_v63, %v1284_v58  ;;  %v1288_v43 = vld [vmem:[#allocation11 + $0x440] sm:$0xff] }
 0x22b   :  { %v1041_v61 = vmax.f32 %v1039_v38, %v1040_v30  ;;  %v2251_v38 = vpack.c.bf16 %v1291_v33, %v1289_v24  ;;  %v1290_v30 = vld [vmem:[#allocation11 + $0x450] sm:$0xff]  ;;  %v1329_v33 = vld [vmem:[#allocation11 + $0x588] sm:$0xff] }
 0x22c   :  { %v1034_v7 = vrot.slane %v1033_v54, 1  ;;  %v1326_v24 = vld [vmem:[#allocation11 + $0x570] sm:$0xff] }
 0x22d   :  { %v1042_v29 = vrot.slane %v1041_v61, 1 }
 0x22e   :  { %v1035_v28 = vmax.f32 %v1033_v54, %v1034_v7  ;;  %v1293_v54 = vld [vmem:[#allocation11 + $0x468] sm:$0xff]  ;;  %v2253_v7 = vpack.c.bf16 %v1290_v30, %v1288_v43  ;;  %v1328_v30 = vld [vmem:[#allocation11 + $0x580] sm:$0xff] }
 0x22f   :  { %v1043_v37 = vmax.f32 %v1041_v61, %v1042_v29  ;;  %v1295_v61 = vld [vmem:[#allocation11 + $0x478] sm:$0xff]  ;;  %v1294_v29 = vld [vmem:[#allocation11 + $0x470] sm:$0xff] }
 0x230   :  { %v2255_v14 = vpack.c.bf16 %v1295_v61, %v1293_v54  ;;  %v2257_v27 = vpack.c.bf16 %v1294_v29, %v1292_v16  ;;  %v1330_v54 = vld [vmem:[#allocation11 + $0x590] sm:$0xff]  ;;  %v1333_v61 = vld [vmem:[#allocation11 + $0x5a8] sm:$0xff]  ;;  %v1332_v29 = vld [vmem:[#allocation11 + $0x5a0] sm:$0xff] }
 0x231   :  { %v1052_v35 = vcombine.low %v1035_v28, %v1043_v37  ;;  %v2259_v28 = vpack.c.bf16 %v1299_v15, %v1297_v25  ;;  %v1296_v37 = vld [vmem:[#allocation11 + $0x480] sm:$0xff]  ;;  %v1334_v25 = vld [vmem:[#allocation11 + $0x5b0] sm:$0xff]  ;;  %v1337_v15 = vld [vmem:[#allocation11 + $0x5c8] sm:$0xff] }
 0x232   :  { %v2261_v49 = vpack.c.bf16 %v1298_v40, %v1296_v37  ;;  %v1336_v40 = vld [vmem:[#allocation11 + $0x5c0] sm:$0xff] }
 0x233   :  { %v1073_v60 = vrot.slane %v1052_v35, %v3050_v9  ;;  %v2263_v35 = vpack.c.bf16 %v1303_v44, %v1301_v41  ;;  %v1338_v41 = vld [vmem:[#allocation11 + $0x5d0] sm:$0xff]  ;;  %v1341_v44 = vld [vmem:[#allocation11 + $0x5e8] sm:$0xff] }
 0x235   :  { %v1088_v6 = vrot.slane %v1073_v60, %v3050_v9  ;;  %v1280_v9 = vld [vmem:[#allocation11 + $0x400] sm:$0xff]  ;;  %v1307_v60 = vld [vmem:[#allocation11 + $0x4d8] sm:$0xff] }
 0x236   :  { %v2245_v55 = vpack.c.bf16 %v1282_v20, %v1280_v9  ;;  %v2267_v3 = vpack.c.bf16 %v1307_v60, %v1305_v1  ;;  %v1318_v9 = vld [vmem:[#allocation11 + $0x530] sm:$0xff]  ;;  %v1321_v20 = vld [vmem:[#allocation11 + $0x548] sm:$0xff] }
 0x237   :  { %v1089_v51 = vcombine.low %v1081_v5, %v1088_v6  ;;  %v1306_v5 = vld [vmem:[#allocation11 + $0x4d0] sm:$0xff]  ;;  %v1309_v6 = vld [vmem:[#allocation11 + $0x4e8] sm:$0xff] }
 0x238   :  { %v2269_v8 = vpack.c.bf16 %v1306_v5, %v1304_v52  ;;  %v1342_v1 = vld [vmem:[#allocation11 + $0x5f0] sm:$0xff]  ;;  %v1604_v52 = vld [vmem:[#allocation12] sm:$0xff] }
 0x239   :  { %1092 = vst.msk [vmem:[#allocation2 + $0x1] ss:$2 sm:$0x3f] %vm3064_vm7, %v1089_v51  ;;  %v2271_v51 = vpack.c.bf16 %v1311_v21, %v1309_v6  ;;  %v1605_v6 = vld [vmem:[#allocation12 + $0x8] sm:$0xff]  ;;  %v1622_v21 = vld [vmem:[#allocation12 + $0x90] sm:$0xff] }
 0x240   :  { %v1093_v45 = vld [vmem:[#allocation2] sm:$0xff]  ;;  %v1094_v2 = vld [vmem:[#allocation2 + $0x8] sm:$0xf] }
 0x241   :  { %v1148_v17 = vadd.f32 %v1137_v26, %v1093_v45  ;;  %v1149_v23 = vadd.f32 %v1145_v42, %v1094_v2  ;;  %v1315_v26 = vld [vmem:[#allocation11 + $0x518] sm:$0xff]  ;;  %v2273_v42 = vpack.c.bf16 %v1310_v62, %v1308_v22  ;;  %v1312_v2 = vld [vmem:[#allocation11 + $0x500] sm:$0xff]  ;;  %v1606_v62 = vld [vmem:[#allocation12 + $0x10] sm:$0xff] }
 0x242   :  { %v2275_v45 = vpack.c.bf16 %v1315_v26, %v1313_v19  ;;  %v1607_v19 = vld [vmem:[#allocation12 + $0x18] sm:$0xff]  ;;  %v1624_v26 = vld [vmem:[#allocation12 + $0xa0] sm:$0xff] }
 0x243   :  { %v1150_v18 = vmax.f32 %v1148_v17, 0.0  ;;  %v1151_v57 = vmax.f32 %v1149_v23, 0.0  ;;  %v1314_v17 = vld [vmem:[#allocation11 + $0x510] sm:$0xff]  ;;  %v1317_v23 = vld [vmem:[#allocation11 + $0x528] sm:$0xff] }
 0x245   :  { %v1365_v59 = vrot.slane %v1150_v18, %v1128_v36  ;;  %v1358_v11 = vcombine.high %v1150_v18, %v1150_v18  ;;  %v3093_v32 = vrot.slane %v1151_v57, %v1128_v36  ;;  %v1319_v18 = vld [vmem:[#allocation11 + $0x538] sm:$0xff]  ;;  %v2277_v57 = vpack.c.bf16 %v1314_v17, %v1312_v2  ;;  %v1608_v17 = vld [vmem:[#allocation12 + $0x20] sm:$0xff] }
 0x247   :  { %v1373_v12 = vcombine.high %v1365_v59, %v1365_v59  ;;  %v1372_v31 = vrot.slane %v1358_v11, %v1128_v36  ;;  %v1382_v10 = vcombine.high %v3093_v32, %v3093_v32  ;;  %v2265_v36 = vpack.c.bf16 %v1302_v39, %v1300_v50  ;;  %v1316_v11 = vld [vmem:[#allocation11 + $0x520] sm:$0xff] }
 0x248   :  { %v1340_v39 = vld [vmem:[#allocation11 + $0x5e0] sm:$0xff] }
 0x249   :  { %1453 = vmatprep.mubr.f32.mxu0 %v1373_v12  ;;  %v1374_v48 = vcombine.high %v1372_v31, %v1372_v31  ;;  %v1323_v12 = vld [vmem:[#allocation11 + $0x558] sm:$0xff]  ;;  %v2305_v60 = vpack.c.bf16 %v1342_v1, %v1340_v39 }
 0x24a   :  { %1454 = vmatmul.mubr.f32.vlgmr.msra.gmra.mrb[12].mxu0 %v1365_v59  ;;  %v2279_v59 = vpack.c.bf16 %v1319_v18, %v1317_v23  ;;  %v2283_v13 = vpack.c.bf16 %v1323_v12, %v1321_v20  ;;  %v1626_v23 = vld [vmem:[#allocation12 + $0xb0] sm:$0xff]  ;;  %v1627_v18 = vld [vmem:[#allocation12 + $0xb8] sm:$0xff]  ;;  %v1628_v20 = vld [vmem:[#allocation12 + $0xc0] sm:$0xff] }
 0x24b   :  { %1524 = vmatprep.mubr.f32.mxu1 %v1374_v48  ;;  %v1322_v48 = vld [vmem:[#allocation11 + $0x550] sm:$0xff]  ;;  %v1629_v12 = vld [vmem:[#allocation12 + $0xc8] sm:$0xff] }
 0x24c   :  { %1525 = vmatmul.mubr.f32.vlgmr.msra.gmra.mrb[12].mxu1 %v1372_v31  ;;  %v2281_v31 = vpack.c.bf16 %v1318_v9, %v1316_v11  ;;  %v2285_v58 = vpack.c.bf16 %v1322_v48, %v1320_v47  ;;  %v1610_v11 = vld [vmem:[#allocation12 + $0x30] sm:$0xff]  ;;  %v1611_v9 = vld [vmem:[#allocation12 + $0x38] sm:$0xff]  ;;  %v1612_v47 = vld [vmem:[#allocation12 + $0x40] sm:$0xff] }
 0x24d   :  { %2246 = vmatpush1.bf16.msra.mxu1 %v2245_v55  ;;  %1595 = vmatprep.mubr.f32.mxu1 %v1382_v10  ;;  %v1325_v55 = vld [vmem:[#allocation11 + $0x568] sm:$0xff]  ;;  %v1324_v10 = vld [vmem:[#allocation11 + $0x560] sm:$0xff] }
 0x24e   :  { %2248 = vmatprep.subr.bf16.mxu1 %v2247_v56  ;;  %v1327_v56 = vld [vmem:[#allocation11 + $0x578] sm:$0xff]  ;;  %v1613_v48 = vld [vmem:[#allocation12 + $0x48] sm:$0xff] }
 0x24f   :  { %v2287_v63 = vpack.c.bf16 %v1327_v56, %v1325_v55  ;;  %v1630_v55 = vld [vmem:[#allocation12 + $0xd0] sm:$0xff]  ;;  %v1631_v56 = vld [vmem:[#allocation12 + $0xd8] sm:$0xff] }
 0x251   :  { %2250 = vmatpush1.bf16.msra.mxu1 %v2249_v34  ;;  %v1331_v34 = vld [vmem:[#allocation11 + $0x598] sm:$0xff] }
 0x252   :  { %2252 = vmatprep.subr.bf16.mxu1 %v2251_v38  ;;  %v2289_v38 = vpack.c.bf16 %v1326_v24, %v1324_v10  ;;  %v2291_v43 = vpack.c.bf16 %v1331_v34, %v1329_v33  ;;  %v1614_v10 = vld [vmem:[#allocation12 + $0x50] sm:$0xff]  ;;  %v1615_v24 = vld [vmem:[#allocation12 + $0x58] sm:$0xff]  ;;  %v1632_v33 = vld [vmem:[#allocation12 + $0xe0] sm:$0xff] }
 0x253   :  { %v1633_v34 = vld [vmem:[#allocation12 + $0xe8] sm:$0xff] }
 0x255   :  { %2254 = vmatpush1.bf16.msra.mxu1 %v2253_v7  ;;  %v1335_v7 = vld [vmem:[#allocation11 + $0x5b8] sm:$0xff] }
 0x256   :  { %2256 = vmatprep.subr.bf16.mxu1 %v2255_v14  ;;  %v2293_v14 = vpack.c.bf16 %v1330_v54, %v1328_v30  ;;  %v2295_v16 = vpack.c.bf16 %v1335_v7, %v1333_v61  ;;  %v1616_v30 = vld [vmem:[#allocation12 + $0x60] sm:$0xff]  ;;  %v1617_v54 = vld [vmem:[#allocation12 + $0x68] sm:$0xff]  ;;  %v1634_v7 = vld [vmem:[#allocation12 + $0xf0] sm:$0xff] }
 0x257   :  { %v2333_v61 = vpack.c.bf16 %v1617_v54, %v1616_v30 }
 0x259   :  { %2258 = vmatpush1.bf16.msra.mxu1 %v2257_v27  ;;  %v1339_v27 = vld [vmem:[#allocation11 + $0x5d8] sm:$0xff] }
 0x25a   :  { %2260 = vmatprep.subr.bf16.mxu1 %v2259_v28  ;;  %v2297_v28 = vpack.c.bf16 %v1334_v25, %v1332_v29  ;;  %v2299_v37 = vpack.c.bf16 %v1339_v27, %v1337_v15  ;;  %v1618_v29 = vld [vmem:[#allocation12 + $0x70] sm:$0xff]  ;;  %v1619_v25 = vld [vmem:[#allocation12 + $0x78] sm:$0xff]  ;;  %v2592_v27 = vmov 0.0|0.0  }
 0x25b   :  { %v2337_v15 = vpack.c.bf16 %v1619_v25, %v1618_v29 }
 0x25d   :  { %2262 = vmatpush1.bf16.msra.mxu1 %v2261_v49  ;;  %v1343_v49 = vld [vmem:[#allocation11 + $0x5f8] sm:$0xff] }
 0x25e   :  { %2264 = vmatprep.subr.bf16.mxu1 %v2263_v35  ;;  %v2301_v35 = vpack.c.bf16 %v1338_v41, %v1336_v40  ;;  %v2303_v50 = vpack.c.bf16 %v1343_v49, %v1341_v44  ;;  %v1344_v40 = vld [vmem:[%s3130_s6] sm:$0x3] }
 0x25f   :  { %v1349_v41 = vrot.slane %v1344_v40, %v1099_v46  ;;  %v1353_v44 = vrot.slane %v1344_v40, %v1103_v4  ;;  %v1719_v4 = vld [vmem:[#allocation14 + $0x28] sm:$0xff] }
 0x261   :  { %2266 = vmatpush1.bf16.msra.mxu1 %v2265_v36  ;;  %v1620_v36 = vld [vmem:[#allocation12 + $0x80] sm:$0xff] }
 0x262   :  { %2268 = vmatprep.subr.bf16.mxu1 %v2267_v3  ;;  %v1621_v3 = vld [vmem:[#allocation12 + $0x88] sm:$0xff] }
 0x263   :  { %v2307_v5 = vpack.c.bf16 %v1621_v3, %v1620_v36  ;;  %v1715_v36 = vld [vmem:[#allocation14 + $0x8] sm:$0xff] }
 0x265   :  { %2270 = vmatpush1.bf16.msra.mxu1 %v2269_v8  ;;  %v1623_v8 = vld [vmem:[#allocation12 + $0x98] sm:$0xff]  ;;  %2308 = vmatprep.subr.bf16.mxu0 %v2307_v5 }
 0x266   :  { %2272 = vmatprep.subr.bf16.mxu1 %v2271_v51  ;;  %v2309_v51 = vpack.c.bf16 %v1605_v6, %v1604_v52  ;;  %v2311_v22 = vpack.c.bf16 %v1623_v8, %v1622_v21  ;;  %v1716_v21 = vld [vmem:[#allocation14 + $0x10] sm:$0xff]  ;;  %v1717_v8 = vld [vmem:[#allocation14 + $0x18] sm:$0xff] }
 0x267   :  { %v2343_v46 = vpack.c.bf16 %v1717_v8, %v1716_v21 }
 0x268   :  { %2310 = vmatpush3.bf16.msra.mxu0 %v2309_v51  ;;  %v2346_v51 = vpack.c.bf16 %v1719_v4, %v1718_v53 }
 0x269   :  { %2274 = vmatpush1.bf16.msra.mxu1 %v2273_v42  ;;  %v1625_v42 = vld [vmem:[#allocation12 + $0xa8] sm:$0xff]  ;;  %2312 = vmatprep.subr.bf16.mxu0 %v2311_v22  ;;  %v1720_v22 = vld [vmem:[#allocation14 + $0x30] sm:$0xff] }
 0x26a   :  { %2276 = vmatprep.subr.bf16.mxu1 %v2275_v45  ;;  %v2313_v45 = vpack.c.bf16 %v1607_v19, %v1606_v62  ;;  %v2315_v2 = vpack.c.bf16 %v1625_v42, %v1624_v26  ;;  %v1721_v62 = vld [vmem:[#allocation14 + $0x38] sm:$0xff]  ;;  %v1722_v26 = vld [vmem:[#allocation14 + $0x40] sm:$0xff]  ;;  %v1723_v42 = vld [vmem:[#allocation14 + $0x48] sm:$0xff] }
 0x26b   :  { %v2349_v19 = vpack.c.bf16 %v1721_v62, %v1720_v22 }
 0x26c   :  { %2314 = vmatpush3.bf16.msra.mxu0 %v2313_v45  ;;  %v2352_v45 = vpack.c.bf16 %v1723_v42, %v1722_v26 }
 0x26d   :  { %2278 = vmatpush1.bf16.msra.mxu1 %v2277_v57  ;;  %2316 = vmatprep.subr.bf16.mxu0 %v2315_v2  ;;  %v1724_v2 = vld [vmem:[#allocation14 + $0x50] sm:$0xff] }
 0x26e   :  { %2280 = vmatprep.subr.bf16.mxu1 %v2279_v59  ;;  %v2319_v59 = vpack.c.bf16 %v1627_v18, %v1626_v23  ;;  %v1726_v23 = vld [vmem:[#allocation14 + $0x60] sm:$0xff]  ;;  %v1727_v18 = vld [vmem:[#allocation14 + $0x68] sm:$0xff] }
 0x271   :  { %2282 = vmatpush1.bf16.msra.mxu1 %v2281_v31  ;;  %v2321_v31 = vpack.c.bf16 %v1611_v9, %v1610_v11  ;;  %v1729_v11 = vld [vmem:[#allocation14 + $0x78] sm:$0xff] }
 0x272   :  { %2284 = vmatprep.subr.bf16.mxu1 %v2283_v13  ;;  %v2323_v13 = vpack.c.bf16 %v1629_v12, %v1628_v20  ;;  %v1834_v12 = vld [vmem:[%s3132_s8] ss:$0 sm:$0xff] }
 0x275   :  { %2286 = vmatpush1.bf16.msra.mxu1 %v2285_v58  ;;  %v2325_v58 = vpack.c.bf16 %v1613_v48, %v1612_v47 }
 0x276   :  { %2288 = vmatprep.subr.bf16.mxu1 %v2287_v63  ;;  %v2327_v63 = vpack.c.bf16 %v1631_v56, %v1630_v55  ;;  %v1835_v55 = vld [vmem:[%s3134_s10] ss:$0 sm:$0xff] }
 0x279   :  { %2290 = vmatpush1.bf16.msra.mxu1 %v2289_v38  ;;  %v2329_v38 = vpack.c.bf16 %v1615_v24, %v1614_v10 }
 0x27a   :  { %2292 = vmatprep.subr.bf16.mxu1 %v2291_v43  ;;  %v2331_v43 = vpack.c.bf16 %v1633_v34, %v1632_v33 }
 0x27d   :  { %2294 = vmatpush1.bf16.msra.mxu1 %v2293_v14  ;;  %v1635_v14 = vld [vmem:[#allocation12 + $0xf8] sm:$0xff] }
 0x27e   :  { %2296 = vmatprep.subr.bf16.mxu1 %v2295_v16  ;;  %v2335_v16 = vpack.c.bf16 %v1635_v14, %v1634_v7 }
 0x281   :  { %2298 = vmatpush1.bf16.msra.mxu1 %v2297_v28 }
 0x282   :  { %2300 = vmatprep.subr.bf16.mxu1 %v2299_v37 }
 0x285   :  { %2302 = vmatpush1.bf16.msra.mxu1 %v2301_v35 }
 0x286   :  { %2304 = vmatprep.subr.bf16.mxu1 %v2303_v50 }
 0x289   :  { %2306 = vmatpush1.bf16.msra.mxu1 %v2305_v60  ;;  %v1714_v60 = vld [vmem:[#allocation14] sm:$0xff] }
 0x28a   :  { %v2340_v5 = vpack.c.bf16 %v1715_v36, %v1714_v60 }
 0x28c   :  { %1596 = vmatmul.mubr.f32.vlgmr.msra.gmra.mrb[12].mxu1 %v3093_v32  ;;  %v1609_v32 = vld [vmem:[#allocation12 + $0x28] sm:$0xff] }
 0x28d   :  { %v2317_v57 = vpack.c.bf16 %v1609_v32, %v1608_v17  ;;  %v1725_v17 = vld [vmem:[#allocation14 + $0x58] sm:$0xff] }
 0x28e   :  { %v2355_v32 = vpack.c.bf16 %v1725_v17, %v1724_v2 }
 0x28f   :  { %2318 = vmatpush3.bf16.msra.mxu0 %v2317_v57  ;;  %v2358_v57 = vpack.c.bf16 %v1727_v18, %v1726_v23 }
 0x290   :  { %2320 = vmatprep.subr.bf16.mxu0 %v2319_v59  ;;  %v1728_v59 = vld [vmem:[#allocation14 + $0x70] sm:$0xff] }
 0x291   :  { %v2361_v9 = vpack.c.bf16 %v1729_v11, %v1728_v59 }
 0x293   :  { %2322 = vmatpush3.bf16.msra.mxu0 %v2321_v31 }
 0x294   :  { %2324 = vmatprep.subr.bf16.mxu0 %v2323_v13 }
 0x297   :  { %2326 = vmatpush3.bf16.msra.mxu0 %v2325_v58 }
 0x298   :  { %2328 = vmatprep.subr.bf16.mxu0 %v2327_v63 }
 0x29b   :  { %2330 = vmatpush3.bf16.msra.mxu0 %v2329_v38 }
 0x29c   :  { %2332 = vmatprep.subr.bf16.mxu0 %v2331_v43 }
 0x29f   :  { %2334 = vmatpush3.bf16.msra.mxu0 %v2333_v61 }
 0x2a0   :  { %2336 = vmatprep.subr.bf16.mxu0 %v2335_v16 }
 0x2a3   :  { %2338 = vmatpush3.bf16.msra.mxu0 %v2337_v15 }
 0x2a4   :  { %2339 = vmatprep.subr.bf16.mxu0 %v2592_v27 }
 0x31d   :  { %v1455_v28 = vpop.f32.mrb[12].mxu0 }
 0x31e   :  { %v1457_v37 = vpop.f32.mrb[13].mxu0  ;;  %v1456_v49 = vadd.f32 %v1455_v28, %v1349_v41 }
 0x31f   :  { %v1458_v35 = vadd.f32 %v1457_v37, %v1353_v44 }
 0x35f   :  { %v1597_v50 = vpop.f32.mrb[12].mxu1 }
 0x360   :  { %v2364_v39 = vadd.f32 %v1597_v50, %v1456_v49  ;;  %v1599_v1 = vpop.f32.mrb[13].mxu1 }
 0x361   :  { %v2366_v3 = vadd.f32 %v1599_v1, %v1458_v35 }
 0x362   :  { %v1602_v6 = vmax.f32 %v2364_v39, 0.0 }
 0x363   :  { %v1603_v52 = vmax.f32 %v2366_v3, 0.0 }
 0x365   :  { %1707 = vmatprep.mubr.f32.mxu0 %v1603_v52 }
 0x366   :  { %1708 = vmatmul.mubr.f32.vlgmr.msra.gmra.mrb[14].mxu0 %v1602_v6 }
 0x367   :  { %2341 = vmatpush3.bf16.msra.mxu0 %v2340_v5  ;;  %1920 = vmatprep.mubr.msk.f32.mxu0 %vm2593_vm8, %v2586_v0 }
 0x368   :  { %2342 = vmatprep.subr.bf16.mxu0 %v2592_v27 }
 0x36b   :  { %2344 = vmatpush3.bf16.msra.mxu0 %v2343_v46 }
 0x36c   :  { %2345 = vmatprep.subr.bf16.mxu0 %v2592_v27 }
 0x36f   :  { %2347 = vmatpush3.bf16.msra.mxu0 %v2346_v51 }
 0x370   :  { %2348 = vmatprep.subr.bf16.mxu0 %v2592_v27 }
 0x373   :  { %2350 = vmatpush3.bf16.msra.mxu0 %v2349_v19 }
 0x374   :  { %2351 = vmatprep.subr.bf16.mxu0 %v2592_v27 }
 0x377   :  { %2353 = vmatpush3.bf16.msra.mxu0 %v2352_v45 }
 0x378   :  { %2354 = vmatprep.subr.bf16.mxu0 %v2592_v27 }
 0x37b   :  { %2356 = vmatpush3.bf16.msra.mxu0 %v2355_v32 }
 0x37c   :  { %2357 = vmatprep.subr.bf16.mxu0 %v2592_v27 }
 0x37f   :  { %2359 = vmatpush3.bf16.msra.mxu0 %v2358_v57 }
 0x380   :  { %2360 = vmatprep.subr.bf16.mxu0 %v2592_v27 }
 0x383   :  { %2362 = vmatpush3.bf16.msra.mxu0 %v2361_v9 }
 0x439   :  { %v1868_v20 = vpop.f32.mrb[14].mxu0 }
 0x43a   :  { %v1869_v31 = vpop.f32.mrb[15].mxu0 }
 0x43b   :  { %v1870_v13 = vadd.f32 %v1869_v31, %v1868_v20 }
 0x43d   :  { %v1710_v47 = vadd.f32 %v1870_v13, %v1834_v12 }
 0x43f   :  { %v1713_v48 = vmax.f32 %v1710_v47, 0.0 }
 0x441   :  { %1921 = vmatmul.mubr.f32.vlgmr.msra.gmra.mrb[16].mxu0 %v1713_v48 }
 0x514   :  { %v1803_v56 = vpop.f32.mrb[16].mxu0 }
 0x515   :  { %v1804_v58 = vadd.f32 %v1835_v55, %v1803_v56  ;;  %v1922_v63 = vpop.f32.mrb[17].mxu0 }
 0x517   :  { %1807 = vst [vmem:[#allocation15] sm:$0x3] %v1804_v58 }
 0x518   :  { %2554 = shalt.err (!%p2551_p4)
}
 0x519   :  { %s2555_s15 = scalar_lea.hbm %s3135_s11, 32 }
 0x51a   :  { %p2556_p5 = scmp.ne.s32.totalorder %s3135_s11, %s2555_s15  ;;  %p2559_p6 = scmp.lt.u32.totalorder %s2555_s15, %s3135_s11 }
 0x51c   :  { %p2561_p7 = pnand %p2559_p6, %p2556_p5 }
 0x51e   :  { %2564 = shalt.err (!%p2561_p7)
}
 0x51f   :  { %1817 = dma.vmem_to_hbm [thread:$0]  %s1815_s16, 32, %s3135_s11, [#allocation5]  }
 0x520   :  { %2573 = dma.done.wait [#allocation5], 32  }
 0x521   :  { %2574 = vsyncadd [#allocation5], 4294967264 }
 0x522   :  { %1821 = vsyncpa [#allocation4], 1 }
 0x523   :  { %1822 = vsyncpa [#allocation7], 1 }
 0x524   :  { %1823 = vsyncpa [#allocation10], 1 }
 0x525   :  { %1824 = vsyncpa [#allocation13], 1 }
 0x526   :  { %1825 = vsyncpa [#allocation5], 1 }

</bundles_post_ra>
